<compile_context>
chip_gen: v7x
topology: tpu7x:2x2x1
jax: 0.10.0
libtpu: 0.0.40
codegen_flags: <defaults>
</compile_context>

<pallas_src>
import jax
import jax.numpy as jnp
from jax import lax
from jax.experimental import pallas as pl
from jax.experimental.pallas import tpu as pltpu


def _gelu_kernel(x_ref, o_ref):
    x = x_ref[...]
    xf = x.astype(jnp.float32)
    # Exact GELU: 0.5 * x * (1 + erf(x / sqrt(2)))
    inv_sqrt2 = jnp.float32(0.7071067811865476)
    y = 0.5 * xf * (1.0 + lax.erf(xf * inv_sqrt2))
    o_ref[...] = y.astype(o_ref.dtype)


def _choose_layout(total: int, last_dim: int):
    """Pick (rows, cols, col_block, n_blocks) with rows % 8 == 0 and a
    lane-dense (multiple-of-128) col block. Prefer an even, small block count
    so the grid pipelines and can shard across v7x's 2 TensorCores."""
    for n_blocks in (2, 4, 3, 1):
        for col_block in range(4096, 127, -128):  # largest lane-dense block first
            cols = n_blocks * col_block
            if total % cols == 0 and (total // cols) % 8 == 0:
                return total // cols, cols, col_block, n_blocks
    # Fallback: single full block with the original trailing dim.
    return total // last_dim, last_dim, last_dim, 1


def gelu_pallas(x: jax.Array) -> jax.Array:
    orig_shape = x.shape
    total = 1
    for d in orig_shape:
        total *= d

    rows, cols, col_block, n_blocks = _choose_layout(total, orig_shape[-1])
    x2d = x.reshape(rows, cols)  # free contiguous reshape

    # Each block is rows * col_block * 4B (~0.6 MB here) — comfortably inside
    # every generation's scoped VMEM with double buffering.
    out = pl.pallas_call(
        _gelu_kernel,
        out_shape=jax.ShapeDtypeStruct((rows, cols), x.dtype),
        grid=(n_blocks,),
        in_specs=[pl.BlockSpec((rows, col_block), lambda i: (0, i))],
        out_specs=pl.BlockSpec((rows, col_block), lambda i: (0, i)),
        compiler_params=pltpu.CompilerParams(
            dimension_semantics=("parallel",)
        ),
    )(x2d)
    return out.reshape(orig_shape)


if __name__ == "__main__":
    key = jax.random.PRNGKey(0)
    # Shape from the module's forward: [1, 7, 7, 6144]
    x = jax.random.normal(key, (1, 7, 7, 6144), dtype=jnp.float32)

    y = gelu_pallas(x)
    jax.block_until_ready(y)

    # Reference check against exact (erf-based) GELU.
    y_ref = jax.nn.gelu(x, approximate=False)
    assert y.shape == x.shape and y.dtype == x.dtype
    assert jnp.allclose(y, y_ref, atol=1e-5, rtol=1e-5)

    print("KERNEL_OK")
</pallas_src>

<mosaic_0001>
module attributes {stable_mosaic.version = 11 : i64} {
  func.func @_gelu_kernel(%arg0: i32, %arg1: memref<56x2688xf32, #tpu.memory_space<vmem>>, %arg2: memref<56x2688xf32, #tpu.memory_space<vmem>>) attributes {dimension_semantics = [#tpu.dimension_semantics<parallel>], iteration_bounds = array<i64: 2>, scalar_prefetch = 0 : i64, scratch_operands = 0 : i64, tpu.core_type = #tpu.core_type<tc>, window_params = [{transform_indices = @transform_0, window_bounds = array<i64: 56, 2688>}, {transform_indices = @transform_1, window_bounds = array<i64: 56, 2688>}]} {
    %c0 = arith.constant 0 : index
    %c0_0 = arith.constant 0 : index
    %0 = vector.load %arg1[%c0, %c0_0] : memref<56x2688xf32, #tpu.memory_space<vmem>>, vector<56x2688xf32>
    %cst = arith.constant 5.000000e-01 : f32
    %1 = vector.broadcast %cst : f32 to vector<56x2688xf32>
    %2 = arith.mulf %1, %0 : vector<56x2688xf32>
    %cst_1 = arith.constant 0.707106769 : f32
    %3 = vector.broadcast %cst_1 : f32 to vector<56x2688xf32>
    %4 = arith.mulf %0, %3 : vector<56x2688xf32>
    %5 = math.erf %4 : vector<56x2688xf32>
    %cst_2 = arith.constant 1.000000e+00 : f32
    %6 = vector.broadcast %cst_2 : f32 to vector<56x2688xf32>
    %7 = arith.addf %6, %5 : vector<56x2688xf32>
    %8 = arith.mulf %2, %7 : vector<56x2688xf32>
    %c0_3 = arith.constant 0 : index
    %c0_4 = arith.constant 0 : index
    %9 = vector.load %arg2[%c0_3, %c0_4] : memref<56x2688xf32, #tpu.memory_space<vmem>>, vector<56x2688xf32>
    tpu.vector_store %arg2[%c0_3, %c0_4], %8 {strides = array<i32>} : memref<56x2688xf32, #tpu.memory_space<vmem>>, vector<56x2688xf32>,
    return
  }
  func.func @transform_0(%arg0: i32) -> (i32, i32) {
    %c0_i32 = arith.constant 0 : i32
    %c0_i32_0 = arith.constant 0 : i32
    return %c0_i32, %arg0 : i32, i32
  }
  func.func @transform_1(%arg0: i32) -> (i32, i32) {
    %c0_i32 = arith.constant 0 : i32
    %c0_i32_0 = arith.constant 0 : i32
    return %c0_i32, %arg0 : i32, i32
  }
}

</mosaic_0001>

<bundles_post_ra>
// kernel: tpu_custom_call.1
= control target key start
LH: loop header
LB: loop body
LE: loop exit
PB: predicated region body
PF: predicated region fallthrough
CT: control target
= control target key end

     0   :  { %6 = vsyncpa [#allocation3], 0  ;;  %s2754_s0 = inlined_call_operand.hbm [shape: f32[56,5376], index: 0, kind: input, shape index: {}]   ;;  %s2755_s1 = inlined_call_operand.hbm [shape: f32[56,5376], index: 1, kind: output, shape index: {}]  }
   0x1   :  { %8 = vsyncpa [#allocation3 + $0x1], 0 }
   0x2   :  { %9 = vsyncpa [#allocation4], 0 }
   0x3   :  { %11 = vsyncpa [#allocation4 + $0x1], 0  ;;  %s1727_s6 = smov 0   ;;  %s1729_s7 = smov 0  }
   0x4   :  { %s1731_s8 = smov 0   ;;  %s1733_s9 = smov 0  }
   0x5 LB: > { %s1748_s10 = sadd.s32 4294967295, %s1707_s9   ;;  %s1253_s11 = sadd.s32 4294967294, %s1707_s9   ;;  %s1707_s9 = sphi %s1733_s9, %s2768_s9   ;;  %s1703_s8 = sphi %s1731_s8, %s2767_s8   ;;  %s1699_s7 = sphi %s1729_s7, %s2766_s7   ;;  %s1695_s6 = sphi %s1727_s6, %s2765_s6  }
   0x6   : > { %s1752_s12 = sadd.s32 1, %s1707_s9   ;;  %s24_s13 = sadd.s32 1, %s1703_s8 }
   0x7   : > { %s21_s14 = ssub.s32 %s1707_s9, %s1752_s12  ;;  %p31_p0 = scmp.ne.s32.totalorder %s1703_s8, %s1699_s7 }
   0x8   : > { %p22_p1 = scmp.eq.s32.totalorder %s21_s14, 0  ;;  %p32_p2 = scmp.eq.s32.totalorder %s1707_s9, 0 }
   0x9   : > { %p37_p3 = scmp.ne.s32.totalorder %s1699_s7, %s1695_s6  ;;  %p38_p4 = scmp.eq.s32.totalorder %s1748_s10, 0 }
   0xa   : > { %s1764_s15 = scalar_select %p22_p1, %s1703_s8, %s24_s13  }
   0xb   : > { %p33_p5 = por %p32_p2, %p31_p0  ;;  %p1766_p6 = por %p38_p4, %p37_p3 }
   0xc   : > { %p61_p7 = scmp.eq.s32.totalorder %s1748_s10, 1  ;;  %p67_p8 = scmp.eq.s32.totalorder %s1253_s11, 1 }
   0xd   : > { %p1277_p10 = scmp.lt.s32.totalorder %s1707_s9, 2  ;;  %s87_s19 = sand.u32 1, %s1703_s8  }
   0xe   : > { %p1773_p11 = por %p61_p7, %p31_p0  ;;  %p1777_p12 = por %p67_p8, %p37_p3 }
   0xf   : > { %s1261_s20 = smul.u32 2688, %s1707_s9  ;;  %p1788_p13 = pnand %p1277_p10, %p33_p5 }
  0x10   : > { %s2758_s17 = scalar_select %p1773_p11, 1, 0 }
  0x11   : > { %s2759_s18 = scalar_select %p1777_p12, 1, 0 }
  0x12   : > { %s1263_s21 = smul.u32 1176, %s87_s19  ;;  %s1786_s24 = scalar_lea.hbm %s2754_s0, %s1261_s20 }
  0x13   : > { %s1795_s28 = scalar_lea.sflag [#allocation3], %s87_s19  ;;  %s1611_s29 = scalar_lea.hbm %s1786_s24, 18816 }
  0x14   : > { %s91_s26 = scalar_lea.vmem [#allocation2], %s1263_s21  ;;  %p1612_p1 = scmp.ne.s32.totalorder %s1786_s24, %s1611_s29 }
  0x15   : > { %s98_s27 = sshll.u32 %s91_s26, 4  ;;  %p1613_p2 = pneg %p1788_p13  ;;  %s1792_s27 = int_to_ptr.vmem [resolvable:$true] %s98_s27 }
  0x16   : > { %s1616_s3 = scalar_lea.hbm %s2754_s0, 37632  ;;  %p1617_p5 = scmp.lt.u32.totalorder %s1786_s24, %s2754_s0 }
  0x17   : > { %p1614_p3 = pnand %p1613_p2, %p1612_p1  ;;  %p1618_p7 = scmp.lt.u32.totalorder %s1616_s3, %s1611_s29 }
  0x18   : > { %p1620_p10 = scmp.lt.u32.totalorder %s1611_s29, %s1786_s24 }
  0x19   : > { %p1615_p4 = pneg %p1614_p3  ;;  %p1619_p8 = por %p1618_p7, %p1617_p5 }
  0x1b   : > { %p1621_p9 = por %p1620_p10, %p1619_p8 }
  0x1d   : > { %p1622_p0 = pnand %p1621_p9, %p1615_p4 }
  0x1f   : > { %1625 = shalt.err (!%p1622_p0)
}
  0x20   : > { %s1626_s11 = scalar_lea.vmem %s1792_s27, 18816  ;;  %s1709_s13 = smov [#allocation2]  }
  0x21   : > { %p1627_p1 = scmp.ne.s32.totalorder %s1792_s27, %s1626_s11  ;;  %s1631_s14 = sshll.u32 %s1709_s13, 4  ;;  %s1632_s14 = int_to_ptr.vmem [resolvable:$false] %s1631_s14 }
  0x22   : > { %s1633_s19 = scalar_lea.vmem %s1632_s14, 37632  ;;  %p1634_p11 = scmp.lt.s32.totalorder %s1792_s27, %s1632_s14 }
  0x23   : > { %p1629_p3 = pnand %p1627_p1, %p1613_p2  ;;  %p1635_p5 = scmp.lt.s32.totalorder %s1633_s19, %s1626_s11 }
  0x25   : > { %p1630_p12 = pneg %p1629_p3  ;;  %p1636_p7 = por %p1635_p5, %p1634_p11 }
  0x27   : > { %p1637_p8 = pnand %p1636_p7, %p1630_p12 }
  0x29   : > { %1640 = shalt.err (!%p1637_p8)
}
  0x2a   : > { %s1710_s20 = smov 5376   ;;  %s1711_s21 = smov 2688  }
  0x2b   : > { %s1712_s22 = smov 168   ;;  %p106_p9 = scmp.lt.s32.totalorder %s1707_s9, 3 }
  0x2c   : > { %1272 = dma.hbm_to_vmem [thread:$0]  (!%p1788_p13), %s1786_s24, 18816, %s1792_s27, %s1795_s28, %s1710_s20, %s1711_s21, %s1712_s22  }
  0x2d   : > { %p2761_p0 = scmp.ge.s32.totalorder %s1707_s9, 1 }
  0x2f   : > { %p107_p2 = pnand %p2761_p0, %p106_p9 }
  0x30   : > { %s1827_s23 = sand.u32 (!%p107_p2), 1, %s1699_s7  }
  0x31   : > { %110 = sbr.rel (%p107_p2) target bundleno = 267 (0x10b), region = 24  ;;  %s113_s29 = scalar_lea.sflag (!%p107_p2), [#allocation3], %s1827_s23 }
  0x32   : > { %s1264_s26 = smul.u32 (!%p107_p2), 1176, %s1827_s23 }
  0x34   : > { %s1833_s30 = scalar_lea.vmem (!%p107_p2), [#allocation2], %s1264_s26 }
  0x38   : > { %1686 = dma.done.wait (%p1766_p6), %s113_s29, 18816  }
  0x39   : > { %1688 = vsyncadd (%p1766_p6), %s113_s29, 4294948480  ;;  %v137_v0 = vld [vmem:[%s1833_s30] sm:$0xff]  ;;  %v138_v1 = vld [vmem:[%s1833_s30 + $0x8] sm:$0xff]  ;;  %s1903_s16 = scalar_lea.vmem [#allocation5], %s1264_s26  ;;  %s1262_s24 = smul.u32 2688, %s1748_s10 }
  0x3a   : > { %v139_v2 = vld [vmem:[%s1833_s30 + $0x10] sm:$0xff]  ;;  %v431_v3 = vmul.f32 0.70710677, %v137_v0  ;;  %v432_v4 = vmul.f32 0.70710677, %v138_v1  ;;  %v140_v6 = vld [vmem:[%s1833_s30 + $0x18] sm:$0xff] }
  0x3b   : > { %v433_v5 = vmul.f32 0.70710677, %v139_v2  ;;  %v141_v7 = vld [vmem:[%s1833_s30 + $0x20] sm:$0xff]  ;;  %v142_v8 = vld [vmem:[%s1833_s30 + $0x28] sm:$0xff]  ;;  %v434_v9 = vmul.f32 0.70710677, %v140_v6  ;;  %s2705_s28 = scalar_lea.hbm %s2755_s1, %s1262_s24 }
  0x3c   : > { %1317 = verf.f32 %v431_v3  ;;  %v143_v10 = vld [vmem:[%s1833_s30 + $0x30] sm:$0xff]  ;;  %v144_v11 = vld [vmem:[%s1833_s30 + $0x38] sm:$0xff]  ;;  %v435_v12 = vmul.f32 0.70710677, %v141_v7  ;;  %v436_v13 = vmul.f32 0.70710677, %v142_v8 }
  0x3d   : > { %1319 = verf.f32 %v432_v4  ;;  %v145_v14 = vld [vmem:[%s1833_s30 + $0x40] sm:$0xff]  ;;  %v284_v15 = vmul.f32 0.5, %v137_v0  ;;  %v437_v16 = vmul.f32 0.70710677, %v143_v10  ;;  %v146_v17 = vld [vmem:[%s1833_s30 + $0x48] sm:$0xff]  ;;  %v285_v18 = vmul.f32 0.5, %v138_v1 }
  0x3e   : > { %1321 = verf.f32 %v433_v5  ;;  %v1849_v19 = vmul.f32 0.5, %v139_v2  ;;  %v438_v20 = vmul.f32 0.70710677, %v144_v11  ;;  %v147_v21 = vld [vmem:[%s1833_s30 + $0x50] sm:$0xff]  ;;  %v1852_v22 = vmul.f32 0.5, %v140_v6  ;;  %v148_v25 = vld [vmem:[%s1833_s30 + $0x58] sm:$0xff] }
  0x3f   : > { %1323 = verf.f32 %v434_v9  ;;  %v1854_v23 = vmul.f32 0.5, %v141_v7  ;;  %v439_v24 = vmul.f32 0.70710677, %v145_v14  ;;  %v1857_v26 = vmul.f32 0.5, %v142_v8  ;;  %v149_v29 = vld [vmem:[%s1833_s30 + $0x60] sm:$0xff]  ;;  %v150_v33 = vld [vmem:[%s1833_s30 + $0x68] sm:$0xff] }
  0x40   : > { %1325 = verf.f32 %v435_v12  ;;  %v1859_v27 = vmul.f32 0.5, %v143_v10  ;;  %v440_v28 = vmul.f32 0.70710677, %v146_v17  ;;  %v1862_v30 = vmul.f32 0.5, %v144_v11  ;;  %v151_v37 = vld [vmem:[%s1833_s30 + $0x70] sm:$0xff]  ;;  %v152_v38 = vld [vmem:[%s1833_s30 + $0x78] sm:$0xff] }
  0x41   : > { %1327 = verf.f32 %v436_v13  ;;  %v1864_v31 = vmul.f32 0.5, %v145_v14  ;;  %v441_v32 = vmul.f32 0.70710677, %v147_v21  ;;  %v1867_v34 = vmul.f32 0.5, %v146_v17  ;;  %v153_v42 = vld [vmem:[%s1833_s30 + $0x80] sm:$0xff]  ;;  %v154_v46 = vld [vmem:[%s1833_s30 + $0x88] sm:$0xff] }
  0x42   : > { %1329 = verf.f32 %v437_v16  ;;  %v1869_v35 = vmul.f32 0.5, %v147_v21  ;;  %v442_v36 = vmul.f32 0.70710677, %v148_v25  ;;  %v1873_v39 = vmul.f32 0.5, %v148_v25  ;;  %v155_v55 = vld [vmem:[%s1833_s30 + $0x90] sm:$0xff]  ;;  %v1891_v60 = vld [vmem:[%s1833_s30 + $0x98] sm:$0xff] }
  0x43   : > { %1331 = verf.f32 %v438_v20  ;;  %v1875_v40 = vmul.f32 0.5, %v149_v29  ;;  %v443_v41 = vmul.f32 0.70710677, %v149_v29  ;;  %v1878_v43 = vmul.f32 0.5, %v150_v33  ;;  %v1896_v1 = vld [vmem:[%s1833_s30 + $0xa0] sm:$0xff]  ;;  %v1899_v6 = vld [vmem:[%s1833_s30 + $0xa8] sm:$0xff] }
  0x44   : > { %1333 = verf.f32 %v439_v24  ;;  %v444_v44 = vmul.f32 0.70710677, %v150_v33  ;;  %v1880_v45 = vmul.f32 0.5, %v151_v37  ;;  %v445_v48 = vmul.f32 0.70710677, %v151_v37  ;;  %v1909_v11 = vld [vmem:[%s1833_s30 + $0xb0] sm:$0xff] }
  0x45   : > { %1335 = verf.f32 %v440_v28  ;;  %v1883_v49 = vmul.f32 0.5, %v152_v38  ;;  %v446_v50 = vmul.f32 0.70710677, %v152_v38  ;;  %v1885_v53 = vmul.f32 0.5, %v153_v42  ;;  %v1915_v16 = vld [vmem:[%s1833_s30 + $0xb8] sm:$0xff]  ;;  %v1921_v21 = vld [vmem:[%s1833_s30 + $0xc0] sm:$0xff] }
  0x46   : > { %v1318_v47 = vpop.eup %1317  ;;  %1337 = verf.f32 %v441_v32  ;;  %v447_v54 = vmul.f32 0.70710677, %v153_v42  ;;  %v1888_v58 = vmul.f32 0.5, %v154_v46  ;;  %v448_v59 = vmul.f32 0.70710677, %v154_v46  ;;  %v1927_v29 = vld [vmem:[%s1833_s30 + $0xc8] sm:$0xff] }
  0x47   : > { %v1320_v51 = vpop.eup %1319  ;;  %v725_v52 = vadd.f32 1.0, %v1318_v47  ;;  %1339 = verf.f32 %v442_v36  ;;  %v1893_v0 = vmul.f32 0.5, %v155_v55  ;;  %v449_v5 = vmul.f32 0.70710677, %v155_v55  ;;  %v1936_v42 = vld [vmem:[%s1833_s30 + $0xd0] sm:$0xff]  ;;  %s1180_s25 = sshll.u32 %s1903_s16, 4  ;;  %s2707_s25 = int_to_ptr.vmem [resolvable:$true] %s1180_s25 }
  0x48   : > { %v1322_v56 = vpop.eup %1321  ;;  %v726_v57 = vadd.f32 1.0, %v1320_v51  ;;  %1341 = verf.f32 %v443_v41  ;;  %v450_v10 = vmul.f32 0.70710677, %v1891_v60  ;;  %v452_v20 = vmul.f32 0.70710677, %v1899_v6  ;;  %s1167_s2 = scalar_lea.sflag [#allocation4], %s1827_s23 }
  0x49   : > { %v1324_v61 = vpop.eup %1323  ;;  %v872_v62 = vmul.f32 %v725_v52, %v284_v15  ;;  %v727_v63 = vadd.f32 1.0, %v1322_v56  ;;  %1343 = verf.f32 %v444_v44  ;;  %v451_v15 = vmul.f32 0.70710677, %v1896_v1  ;;  %v1947_v52 = vld [vmem:[%s1833_s30 + $0xd8] sm:$0xff]  ;;  %s1641_s3 = scalar_lea.vmem %s2707_s25, 18816  ;;  %p2762_p11 = scmp.ne.s32.totalorder %s2758_s17, 0 }
  0x4a   : > { %v1326_v2 = vpop.eup %1325  ;;  %v873_v3 = vmul.f32 %v726_v57, %v285_v18  ;;  %v728_v4 = vadd.f32 1.0, %v1324_v61  ;;  %1345 = verf.f32 %v445_v48  ;;  %v453_v28 = vmul.f32 0.70710677, %v1909_v11  ;;  %v1956_v61 = vld [vmem:[%s1833_s30 + $0xe0] sm:$0xff]  ;;  %p1642_p6 = scmp.ne.s32.totalorder %s2707_s25, %s1641_s3  ;;  %s1713_s4 = smov [#allocation5]  }
  0x4b   : > { %v1328_v7 = vpop.eup %1327  ;;  %1019 = vst [vmem:[%s1903_s16] sm:$0xff] %v872_v62  ;;  %v874_v8 = vmul.f32 %v727_v63, %v1849_v19  ;;  %v729_v9 = vadd.f32 1.0, %v1326_v2  ;;  %1347 = verf.f32 %v446_v50  ;;  %v454_v36 = vmul.f32 0.70710677, %v1915_v16  ;;  %s1645_s5 = sshll.u32 %s1713_s4, 4  ;;  %s1646_s5 = int_to_ptr.vmem [resolvable:$false] %s1645_s5 }
  0x4c   : > { %v1330_v12 = vpop.eup %1329  ;;  %1020 = vst [vmem:[%s1903_s16 + $0x8] sm:$0xff] %v873_v3  ;;  %v875_v13 = vmul.f32 %v728_v4, %v1852_v22  ;;  %v730_v14 = vadd.f32 1.0, %v1328_v7  ;;  %1349 = verf.f32 %v447_v54  ;;  %v455_v41 = vmul.f32 0.70710677, %v1921_v21  ;;  %v1962_v3 = vld [vmem:[%s1833_s30 + $0xe8] sm:$0xff]  ;;  %p1643_p12 = pnand %p1642_p6, %p2762_p11  ;;  %s1647_s11 = scalar_lea.vmem %s1646_s5, 37632 }
  0x4d   : > { %v1332_v17 = vpop.eup %1331  ;;  %1021 = vst [vmem:[%s1903_s16 + $0x10] sm:$0xff] %v874_v8  ;;  %v876_v18 = vmul.f32 %v729_v9, %v1854_v23  ;;  %v731_v19 = vadd.f32 1.0, %v1330_v12  ;;  %1351 = verf.f32 %v448_v59  ;;  %v456_v47 = vmul.f32 0.70710677, %v1927_v29  ;;  %p1648_p4 = scmp.lt.s32.totalorder %s2707_s25, %s1646_s5  ;;  %p1649_p10 = scmp.lt.s32.totalorder %s1647_s11, %s1641_s3 }
  0x4e   : > { %v1334_v22 = vpop.eup %1333  ;;  %1022 = vst [vmem:[%s1903_s16 + $0x18] sm:$0xff] %v875_v13  ;;  %v877_v24 = vmul.f32 %v730_v14, %v1857_v26  ;;  %v732_v25 = vadd.f32 1.0, %v1332_v17  ;;  %1353 = verf.f32 %v449_v5  ;;  %v1944_v51 = vmul.f32 0.5, %v1891_v60  ;;  %p1644_p13 = pneg %p1643_p12 }
  0x4f   : > { %v1336_v23 = vpop.eup %1335  ;;  %1023 = vst [vmem:[%s1903_s16 + $0x20] sm:$0xff] %v876_v18  ;;  %v878_v32 = vmul.f32 %v731_v19, %v1859_v27  ;;  %v733_v33 = vadd.f32 1.0, %v1334_v22  ;;  %1355 = verf.f32 %v450_v10  ;;  %v457_v56 = vmul.f32 0.70710677, %v1936_v42  ;;  %v1971_v10 = vld [vmem:[%s1833_s30 + $0xf0] sm:$0xff]  ;;  %p1650_p1 = por %p1649_p10, %p1648_p4 }
  0x50   : > { %v1338_v37 = vpop.eup %1337  ;;  %1024 = vst [vmem:[%s1903_s16 + $0x28] sm:$0xff] %v877_v24  ;;  %v879_v26 = vmul.f32 %v732_v25, %v1862_v30  ;;  %v734_v38 = vadd.f32 1.0, %v1336_v23  ;;  %1357 = verf.f32 %v451_v15  ;;  %v304_v60 = vmul.f32 0.5, %v1896_v1  ;;  %v1978_v15 = vld [vmem:[%s1833_s30 + $0xf8] sm:$0xff]  ;;  %v1987_v24 = vld [vmem:[%s1833_s30 + $0x100] sm:$0xff] }
  0x51   : > { %v1340_v44 = vpop.eup %1339  ;;  %1025 = vst [vmem:[%s1903_s16 + $0x30] sm:$0xff] %v878_v32  ;;  %v880_v27 = vmul.f32 %v733_v33, %v1864_v31  ;;  %v735_v46 = vadd.f32 1.0, %v1338_v37  ;;  %1359 = verf.f32 %v452_v20  ;;  %v458_v2 = vmul.f32 0.70710677, %v1947_v52  ;;  %v1994_v32 = vld [vmem:[%s1833_s30 + $0x108] sm:$0xff]  ;;  %p1651_p3 = pnand %p1650_p1, %p1644_p13 }
  0x52   : > { %v1342_v48 = vpop.eup %1341  ;;  %1026 = vst [vmem:[%s1903_s16 + $0x38] sm:$0xff] %v879_v26  ;;  %v881_v30 = vmul.f32 %v734_v38, %v1867_v34  ;;  %v736_v50 = vadd.f32 1.0, %v1340_v44  ;;  %1361 = verf.f32 %v453_v28  ;;  %v305_v5 = vmul.f32 0.5, %v1899_v6 }
  0x53   : > { %v1344_v54 = vpop.eup %1343  ;;  %1027 = vst [vmem:[%s1903_s16 + $0x40] sm:$0xff] %v880_v27  ;;  %v882_v31 = vmul.f32 %v735_v46, %v1869_v35  ;;  %v737_v55 = vadd.f32 1.0, %v1342_v48  ;;  %1363 = verf.f32 %v454_v36  ;;  %v459_v9 = vmul.f32 0.70710677, %v1956_v61  ;;  %v2008_v48 = vld [vmem:[%s1833_s30 + $0x118] sm:$0xff] }
  0x54   : > { %v1346_v34 = vpop.eup %1345  ;;  %1028 = vst [vmem:[%s1903_s16 + $0x48] sm:$0xff] %v881_v30  ;;  %v883_v57 = vmul.f32 %v736_v50, %v1873_v39  ;;  %v738_v59 = vadd.f32 1.0, %v1344_v54  ;;  %1365 = verf.f32 %v455_v41  ;;  %v306_v6 = vmul.f32 0.5, %v1909_v11  ;;  %v2002_v41 = vld [vmem:[%s1833_s30 + $0x110] sm:$0xff] }
  0x55   : > { %v1348_v62 = vpop.eup %1347  ;;  %1029 = vst [vmem:[%s1903_s16 + $0x50] sm:$0xff] %v882_v31  ;;  %v884_v35 = vmul.f32 %v737_v55, %v1875_v40  ;;  %v739_v63 = vadd.f32 1.0, %v1346_v34  ;;  %1367 = verf.f32 %v456_v47  ;;  %v460_v14 = vmul.f32 0.70710677, %v1962_v3  ;;  %v2015_v34 = vld [vmem:[%s1833_s30 + $0x120] sm:$0xff] }
  0x56   : > { %v1350_v39 = vpop.eup %1349  ;;  %1030 = vst [vmem:[%s1903_s16 + $0x58] sm:$0xff] %v883_v57  ;;  %v885_v1 = vmul.f32 %v738_v59, %v1878_v43  ;;  %v740_v4 = vadd.f32 1.0, %v1348_v62  ;;  %1369 = verf.f32 %v457_v56  ;;  %v307_v19 = vmul.f32 0.5, %v1915_v16 }
  0x57   : > { %v1352_v7 = vpop.eup %1351  ;;  %1031 = vst [vmem:[%s1903_s16 + $0x60] sm:$0xff] %v884_v35  ;;  %v886_v40 = vmul.f32 %v739_v63, %v1880_v45  ;;  %v741_v8 = vadd.f32 1.0, %v1350_v39  ;;  %1371 = verf.f32 %v458_v2  ;;  %v461_v22 = vmul.f32 0.70710677, %v1971_v10  ;;  %v2025_v39 = vld [vmem:[%s1833_s30 + $0x130] sm:$0xff] }
  0x58   : > { %v1354_v12 = vpop.eup %1353  ;;  %1032 = vst [vmem:[%s1903_s16 + $0x68] sm:$0xff] %v885_v1  ;;  %v887_v43 = vmul.f32 %v740_v4, %v1883_v49  ;;  %v742_v13 = vadd.f32 1.0, %v1352_v7  ;;  %1373 = verf.f32 %v459_v9  ;;  %v308_v16 = vmul.f32 0.5, %v1921_v21 }
  0x59   : > { %v1356_v45 = vpop.eup %1355  ;;  %1033 = vst [vmem:[%s1903_s16 + $0x70] sm:$0xff] %v886_v40  ;;  %v888_v17 = vmul.f32 %v741_v8, %v1885_v53  ;;  %v743_v18 = vadd.f32 1.0, %v1354_v12  ;;  %1375 = verf.f32 %v460_v14  ;;  %v462_v23 = vmul.f32 0.70710677, %v1978_v15  ;;  %v2031_v40 = vld [vmem:[%s1833_s30 + $0x138] sm:$0xff] }
  0x5a   : > { %v1358_v49 = vpop.eup %1357  ;;  %1034 = vst [vmem:[%s1903_s16 + $0x78] sm:$0xff] %v887_v43  ;;  %v889_v20 = vmul.f32 %v742_v13, %v1888_v58  ;;  %v744_v11 = vadd.f32 1.0, %v1356_v45  ;;  %v309_v37 = vmul.f32 0.5, %v1927_v29  ;;  %1377 = verf.f32 %v461_v22  ;;  %v2037_v13 = vld [vmem:[%s1833_s30 + $0x140] sm:$0xff]  ;;  %v2043_v45 = vld [vmem:[%s1833_s30 + $0x148] sm:$0xff] }
  0x5b   : > { %v1360_v25 = vpop.eup %1359  ;;  %1035 = vst [vmem:[%s1903_s16 + $0x80] sm:$0xff] %v888_v17  ;;  %v890_v53 = vmul.f32 %v743_v18, %v1893_v0  ;;  %v745_v28 = vadd.f32 1.0, %v1358_v49  ;;  %1379 = verf.f32 %v462_v23  ;;  %v463_v21 = vmul.f32 0.70710677, %v1987_v24  ;;  %v2049_v49 = vld [vmem:[%s1833_s30 + $0x150] sm:$0xff] }
  0x5c   : > { %v1362_v58 = vpop.eup %1361  ;;  %1036 = vst [vmem:[%s1903_s16 + $0x88] sm:$0xff] %v889_v20  ;;  %v891_v33 = vmul.f32 %v744_v11, %v1944_v51  ;;  %v746_v36 = vadd.f32 1.0, %v1360_v25  ;;  %v310_v47 = vmul.f32 0.5, %v1936_v42  ;;  %v464_v29 = vmul.f32 0.70710677, %v1994_v32 }
  0x5d   : > { %v1364_v0 = vpop.eup %1363  ;;  %1037 = vst [vmem:[%s1903_s16 + $0x90] sm:$0xff] %v890_v53  ;;  %v892_v26 = vmul.f32 %v745_v28, %v304_v60  ;;  %v747_v38 = vadd.f32 1.0, %v1362_v58  ;;  %v311_v54 = vmul.f32 0.5, %v1947_v52  ;;  %1381 = verf.f32 %v463_v21  ;;  %v2020_v52 = vld [vmem:[%s1833_s30 + $0x128] sm:$0xff]  ;;  %v2056_v28 = vld [vmem:[%s1833_s30 + $0x158] sm:$0xff] }
  0x5e   : > { %v1366_v44 = vpop.eup %1365  ;;  %1038 = vst [vmem:[%s1903_s16 + $0x98] sm:$0xff] %v891_v33  ;;  %v893_v27 = vmul.f32 %v746_v36, %v305_v5  ;;  %v748_v46 = vadd.f32 1.0, %v1364_v0  ;;  %1383 = verf.f32 %v464_v29  ;;  %v465_v42 = vmul.f32 0.70710677, %v2002_v41  ;;  %v2062_v36 = vld [vmem:[%s1833_s30 + $0x160] sm:$0xff] }
  0x5f   : > { %v1368_v30 = vpop.eup %1367  ;;  %1039 = vst [vmem:[%s1903_s16 + $0xa0] sm:$0xff] %v892_v26  ;;  %v894_v50 = vmul.f32 %v747_v38, %v306_v6  ;;  %v749_v51 = vadd.f32 1.0, %v1366_v44  ;;  %v466_v62 = vmul.f32 0.70710677, %v2008_v48  ;;  %v312_v2 = vmul.f32 0.5, %v1956_v61 }
  0x60   : > { %v1370_v31 = vpop.eup %1369  ;;  %1040 = vst [vmem:[%s1903_s16 + $0xa8] sm:$0xff] %v893_v27  ;;  %v895_v55 = vmul.f32 %v748_v46, %v307_v19  ;;  %v750_v56 = vadd.f32 1.0, %v1368_v30  ;;  %1385 = verf.f32 %v465_v42  ;;  %v313_v5 = vmul.f32 0.5, %v1962_v3  ;;  %v2072_v27 = vld [vmem:[%s1833_s30 + $0x170] sm:$0xff] }
  0x61   : > { %v1372_v57 = vpop.eup %1371  ;;  %1041 = vst [vmem:[%s1903_s16 + $0xb0] sm:$0xff] %v894_v50  ;;  %v896_v59 = vmul.f32 %v749_v51, %v308_v16  ;;  %v751_v60 = vadd.f32 1.0, %v1370_v31  ;;  %1387 = verf.f32 %v466_v62  ;;  %v467_v7 = vmul.f32 0.70710677, %v2015_v34  ;;  %v2079_v50 = vld [vmem:[%s1833_s30 + $0x178] sm:$0xff] }
  0x62   : > { %1042 = vst [vmem:[%s1903_s16 + $0xb8] sm:$0xff] %v895_v55  ;;  %v897_v35 = vmul.f32 %v750_v56, %v309_v37  ;;  %v752_v63 = vadd.f32 1.0, %v1372_v57  ;;  %v1374_v1 = vpop.eup %1373  ;;  %v314_v12 = vmul.f32 0.5, %v1971_v10  ;;  %v468_v43 = vmul.f32 0.70710677, %v2020_v52  ;;  %v2065_v37 = vld [vmem:[%s1833_s30 + $0x168] sm:$0xff] }
  0x63   : > { %1043 = vst [vmem:[%s1903_s16 + $0xc0] sm:$0xff] %v896_v59  ;;  %v898_v4 = vmul.f32 %v751_v60, %v310_v47  ;;  %v1376_v8 = vpop.eup %1375  ;;  %v753_v9 = vadd.f32 1.0, %v1374_v1  ;;  %v315_v6 = vmul.f32 0.5, %v1978_v15  ;;  %1389 = verf.f32 %v467_v7  ;;  %v2083_v56 = vld [vmem:[%s1833_s30 + $0x180] sm:$0xff]  ;;  %v2089_v59 = vld [vmem:[%s1833_s30 + $0x188] sm:$0xff] }
  0x64   : > { %1044 = vst [vmem:[%s1903_s16 + $0xc8] sm:$0xff] %v897_v35  ;;  %v899_v61 = vmul.f32 %v752_v63, %v311_v54  ;;  %v754_v3 = vadd.f32 1.0, %v1376_v8  ;;  %v469_v14 = vmul.f32 0.70710677, %v2025_v39  ;;  %v1378_v17 = vpop.eup %1377  ;;  %v316_v10 = vmul.f32 0.5, %v1987_v24 }
  0x65   : > { %1045 = vst [vmem:[%s1903_s16 + $0xd0] sm:$0xff] %v898_v4  ;;  %v900_v18 = vmul.f32 %v753_v9, %v312_v2  ;;  %1391 = verf.f32 %v468_v43  ;;  %v470_v19 = vmul.f32 0.70710677, %v2031_v40  ;;  %v1380_v20 = vpop.eup %1379  ;;  %v755_v11 = vadd.f32 1.0, %v1378_v17  ;;  %v2096_v4 = vld [vmem:[%s1833_s30 + $0x190] sm:$0xff]  ;;  %v2108_v17 = vld [vmem:[%s1833_s30 + $0x1a0] sm:$0xff] }
  0x66   : > { %1046 = vst [vmem:[%s1903_s16 + $0xd8] sm:$0xff] %v899_v61  ;;  %v901_v15 = vmul.f32 %v754_v3, %v313_v5  ;;  %1393 = verf.f32 %v469_v14  ;;  %v471_v22 = vmul.f32 0.70710677, %v2037_v13  ;;  %v756_v25 = vadd.f32 1.0, %v1380_v20  ;;  %v2102_v61 = vld [vmem:[%s1833_s30 + $0x198] sm:$0xff] }
  0x67   : > { %1047 = vst [vmem:[%s1903_s16 + $0xe0] sm:$0xff] %v900_v18  ;;  %v317_v53 = vmul.f32 0.5, %v1994_v32  ;;  %1395 = verf.f32 %v470_v19  ;;  %v472_v24 = vmul.f32 0.70710677, %v2043_v45  ;;  %v1382_v16 = vpop.eup %1381  ;;  %v902_v23 = vmul.f32 %v755_v11, %v314_v12 }
  0x68   : > { %1048 = vst [vmem:[%s1903_s16 + $0xe8] sm:$0xff] %v901_v15  ;;  %v318_v58 = vmul.f32 0.5, %v2002_v41  ;;  %1397 = verf.f32 %v471_v22  ;;  %v473_v33 = vmul.f32 0.70710677, %v2049_v49  ;;  %v1384_v32 = vpop.eup %1383  ;;  %v903_v0 = vmul.f32 %v756_v25, %v315_v6  ;;  %v2114_v15 = vld [vmem:[%s1833_s30 + $0x1a8] sm:$0xff] }
  0x69   : > { %v757_v26 = vadd.f32 1.0, %v1382_v16  ;;  %v319_v38 = vmul.f32 0.5, %v2008_v48  ;;  %1399 = verf.f32 %v472_v24  ;;  %1049 = vst [vmem:[%s1903_s16 + $0xf0] sm:$0xff] %v902_v23  ;;  %v758_v21 = vadd.f32 1.0, %v1384_v32  ;;  %v2119_v24 = vld [vmem:[%s1833_s30 + $0x1b0] sm:$0xff] }
  0x6a   : > { %v320_v44 = vmul.f32 0.5, %v2015_v34  ;;  %1401 = verf.f32 %v473_v33  ;;  %v474_v41 = vmul.f32 0.70710677, %v2056_v28  ;;  %v1386_v46 = vpop.eup %1385  ;;  %1050 = vst [vmem:[%s1903_s16 + $0xf8] sm:$0xff] %v903_v0  ;;  %v321_v29 = vmul.f32 0.5, %v2020_v52 }
  0x6b   : > { %v904_v47 = vmul.f32 %v757_v26, %v316_v10  ;;  %v475_v48 = vmul.f32 0.70710677, %v2062_v36  ;;  %v476_v30 = vmul.f32 0.70710677, %v2065_v37  ;;  %v1388_v51 = vpop.eup %1387  ;;  %v905_v54 = vmul.f32 %v758_v21, %v317_v53 }
  0x6c   : > { %v759_v31 = vadd.f32 1.0, %v1386_v46  ;;  %v322_v55 = vmul.f32 0.5, %v2025_v39  ;;  %1403 = verf.f32 %v474_v41  ;;  %v760_v42 = vadd.f32 1.0, %v1388_v51  ;;  %v2133_v46 = vld [vmem:[%s1833_s30 + $0x1c0] sm:$0xff] }
  0x6d   : > { %1051 = vst [vmem:[%s1903_s16 + $0x100] sm:$0xff] %v904_v47  ;;  %v323_v34 = vmul.f32 0.5, %v2031_v40  ;;  %1405 = verf.f32 %v475_v48  ;;  %v477_v57 = vmul.f32 0.70710677, %v2072_v27  ;;  %v1390_v60 = vpop.eup %1389  ;;  %1052 = vst [vmem:[%s1903_s16 + $0x108] sm:$0xff] %v905_v54  ;;  %v324_v52 = vmul.f32 0.5, %v2037_v13 }
  0x6e   : > { %v906_v62 = vmul.f32 %v759_v31, %v318_v58  ;;  %1407 = verf.f32 %v476_v30  ;;  %v478_v35 = vmul.f32 0.70710677, %v2079_v50  ;;  %v907_v2 = vmul.f32 %v760_v42, %v319_v38  ;;  %v2124_v58 = vld [vmem:[%s1833_s30 + $0x1b8] sm:$0xff]  ;;  %v2139_v48 = vld [vmem:[%s1833_s30 + $0x1c8] sm:$0xff] }
  0x6f   : > { %v1392_v63 = vpop.eup %1391  ;;  %v761_v39 = vadd.f32 1.0, %v1390_v60  ;;  %1409 = verf.f32 %v477_v57  ;;  %v479_v1 = vmul.f32 0.70710677, %v2083_v56  ;;  %v325_v40 = vmul.f32 0.5, %v2043_v45  ;;  %v2145_v57 = vld [vmem:[%s1833_s30 + $0x1d0] sm:$0xff] }
  0x70   : > { %v1394_v5 = vpop.eup %1393  ;;  %1053 = vst [vmem:[%s1903_s16 + $0x110] sm:$0xff] %v906_v62  ;;  %v762_v7 = vadd.f32 1.0, %v1392_v63  ;;  %1411 = verf.f32 %v478_v35  ;;  %v480_v8 = vmul.f32 0.70710677, %v2089_v59  ;;  %1054 = vst [vmem:[%s1903_s16 + $0x118] sm:$0xff] %v907_v2  ;;  %v326_v13 = vmul.f32 0.5, %v2049_v49 }
  0x71   : > { %v1396_v9 = vpop.eup %1395  ;;  %v908_v12 = vmul.f32 %v761_v39, %v320_v44  ;;  %v763_v43 = vadd.f32 1.0, %v1394_v5  ;;  %1413 = verf.f32 %v479_v1  ;;  %v481_v45 = vmul.f32 0.70710677, %v2096_v4  ;;  %v2151_v63 = vld [vmem:[%s1833_s30 + $0x1d8] sm:$0xff] }
  0x72   : > { %v1398_v3 = vpop.eup %1397  ;;  %v909_v6 = vmul.f32 %v762_v7, %v321_v29  ;;  %v764_v14 = vadd.f32 1.0, %v1396_v9  ;;  %1415 = verf.f32 %v480_v8  ;;  %v327_v20 = vmul.f32 0.5, %v2056_v28  ;;  %v2156_v7 = vld [vmem:[%s1833_s30 + $0x1e0] sm:$0xff]  ;;  %v2161_v9 = vld [vmem:[%s1833_s30 + $0x1e8] sm:$0xff] }
  0x73   : > { %v1400_v18 = vpop.eup %1399  ;;  %1055 = vst [vmem:[%s1903_s16 + $0x120] sm:$0xff] %v908_v12  ;;  %v910_v10 = vmul.f32 %v763_v43, %v322_v55  ;;  %v765_v19 = vadd.f32 1.0, %v1398_v3  ;;  %v482_v49 = vmul.f32 0.70710677, %v2102_v61  ;;  %v328_v53 = vmul.f32 0.5, %v2062_v36  ;;  %v2167_v3 = vld [vmem:[%s1833_s30 + $0x1f0] sm:$0xff] }
  0x74   : > { %v1402_v11 = vpop.eup %1401  ;;  %1056 = vst [vmem:[%s1903_s16 + $0x128] sm:$0xff] %v909_v6  ;;  %v911_v22 = vmul.f32 %v764_v14, %v323_v34  ;;  %v766_v25 = vadd.f32 1.0, %v1400_v18  ;;  %1417 = verf.f32 %v481_v45  ;;  %v483_v28 = vmul.f32 0.70710677, %v2108_v17 }
  0x75   : > { %1057 = vst [vmem:[%s1903_s16 + $0x130] sm:$0xff] %v910_v10  ;;  %v912_v16 = vmul.f32 %v765_v19, %v324_v52  ;;  %v767_v23 = vadd.f32 1.0, %v1402_v11  ;;  %1419 = verf.f32 %v482_v49  ;;  %v329_v0 = vmul.f32 0.5, %v2065_v37 }
  0x76   : > { %v1404_v33 = vpop.eup %1403  ;;  %1058 = vst [vmem:[%s1903_s16 + $0x138] sm:$0xff] %v911_v22  ;;  %v913_v32 = vmul.f32 %v766_v25, %v325_v40  ;;  %v330_v36 = vmul.f32 0.5, %v2072_v27  ;;  %v484_v26 = vmul.f32 0.70710677, %v2114_v15  ;;  %1421 = verf.f32 %v483_v28 }
  0x77   : > { %v1406_v38 = vpop.eup %1405  ;;  %1059 = vst [vmem:[%s1903_s16 + $0x140] sm:$0xff] %v912_v16  ;;  %v914_v21 = vmul.f32 %v767_v23, %v326_v13  ;;  %v768_v44 = vadd.f32 1.0, %v1404_v33  ;;  %v485_v41 = vmul.f32 0.70710677, %v2119_v24  ;;  %v331_v37 = vmul.f32 0.5, %v2079_v50  ;;  %v2185_v33 = vld [vmem:[%s1833_s30 + $0x208] sm:$0xff] }
  0x78   : > { %v1408_v47 = vpop.eup %1407  ;;  %1060 = vst [vmem:[%s1903_s16 + $0x148] sm:$0xff] %v913_v32  ;;  %v769_v29 = vadd.f32 1.0, %v1406_v38  ;;  %1423 = verf.f32 %v484_v26  ;;  %v486_v27 = vmul.f32 0.70710677, %v2124_v58  ;;  %v332_v31 = vmul.f32 0.5, %v2083_v56  ;;  %v2191_v26 = vld [vmem:[%s1833_s30 + $0x210] sm:$0xff] }
  0x79   : > { %v1410_v30 = vpop.eup %1409  ;;  %1061 = vst [vmem:[%s1903_s16 + $0x150] sm:$0xff] %v914_v21  ;;  %v915_v51 = vmul.f32 %v768_v44, %v327_v20  ;;  %v770_v54 = vadd.f32 1.0, %v1408_v47  ;;  %1425 = verf.f32 %v485_v41  ;;  %v487_v50 = vmul.f32 0.70710677, %v2133_v46  ;;  %v2175_v20 = vld [vmem:[%s1833_s30 + $0x1f8] sm:$0xff] }
  0x7a   : > { %v1412_v55 = vpop.eup %1411  ;;  %v916_v42 = vmul.f32 %v769_v29, %v328_v53  ;;  %v771_v34 = vadd.f32 1.0, %v1410_v30  ;;  %1427 = verf.f32 %v486_v27  ;;  %v333_v35 = vmul.f32 0.5, %v2089_v59  ;;  %v2181_v53 = vld [vmem:[%s1833_s30 + $0x200] sm:$0xff] }
  0x7b   : > { %v1414_v60 = vpop.eup %1413  ;;  %1062 = vst [vmem:[%s1903_s16 + $0x158] sm:$0xff] %v915_v51  ;;  %v917_v62 = vmul.f32 %v770_v54, %v329_v0  ;;  %v772_v52 = vadd.f32 1.0, %v1412_v55  ;;  %v488_v56 = vmul.f32 0.70710677, %v2139_v48  ;;  %v334_v5 = vmul.f32 0.5, %v2096_v4  ;;  %v2204_v54 = vld [vmem:[%s1833_s30 + $0x220] sm:$0xff] }
  0x7c   : > { %v1416_v2 = vpop.eup %1415  ;;  %1063 = vst [vmem:[%s1903_s16 + $0x160] sm:$0xff] %v916_v42  ;;  %v918_v39 = vmul.f32 %v771_v34, %v330_v36  ;;  %v773_v1 = vadd.f32 1.0, %v1414_v60  ;;  %1429 = verf.f32 %v487_v50  ;;  %v489_v59 = vmul.f32 0.70710677, %v2145_v57 }
  0x7d   : > { %1064 = vst [vmem:[%s1903_s16 + $0x168] sm:$0xff] %v917_v62  ;;  %v919_v40 = vmul.f32 %v772_v52, %v331_v37  ;;  %v774_v8 = vadd.f32 1.0, %v1416_v2  ;;  %1431 = verf.f32 %v488_v56  ;;  %v335_v13 = vmul.f32 0.5, %v2102_v61  ;;  %v2198_v37 = vld [vmem:[%s1833_s30 + $0x218] sm:$0xff]  ;;  %v2215_v52 = vld [vmem:[%s1833_s30 + $0x230] sm:$0xff] }
  0x7e   : > { %v1418_v12 = vpop.eup %1417  ;;  %1065 = vst [vmem:[%s1903_s16 + $0x170] sm:$0xff] %v918_v39  ;;  %v920_v43 = vmul.f32 %v773_v1, %v332_v31  ;;  %v490_v4 = vmul.f32 0.70710677, %v2151_v63  ;;  %1433 = verf.f32 %v489_v59  ;;  %v491_v18 = vmul.f32 0.70710677, %v2156_v7  ;;  %v2207_v31 = vld [vmem:[%s1833_s30 + $0x228] sm:$0xff] }
  0x7f   : > { %v1420_v6 = vpop.eup %1419  ;;  %1066 = vst [vmem:[%s1903_s16 + $0x178] sm:$0xff] %v919_v40  ;;  %v921_v14 = vmul.f32 %v774_v8, %v333_v35  ;;  %v775_v45 = vadd.f32 1.0, %v1418_v12  ;;  %v336_v19 = vmul.f32 0.5, %v2108_v17  ;;  %v492_v61 = vmul.f32 0.70710677, %v2161_v9  ;;  %v2222_v1 = vld [vmem:[%s1833_s30 + $0x238] sm:$0xff] }
  0x80   : > { %1067 = vst [vmem:[%s1903_s16 + $0x180] sm:$0xff] %v920_v43  ;;  %v776_v10 = vadd.f32 1.0, %v1420_v6  ;;  %1435 = verf.f32 %v490_v4  ;;  %v1422_v49 = vpop.eup %1421  ;;  %v337_v22 = vmul.f32 0.5, %v2114_v15  ;;  %v493_v25 = vmul.f32 0.70710677, %v2167_v3 }
  0x81   : > { %1068 = vst [vmem:[%s1903_s16 + $0x188] sm:$0xff] %v921_v14  ;;  %v922_v11 = vmul.f32 %v775_v45, %v334_v5  ;;  %1437 = verf.f32 %v491_v18  ;;  %v777_v23 = vadd.f32 1.0, %v1422_v49  ;;  %v338_v28 = vmul.f32 0.5, %v2119_v24  ;;  %v2234_v45 = vld [vmem:[%s1833_s30 + $0x248] sm:$0xff] }
  0x82   : > { %v1424_v17 = vpop.eup %1423  ;;  %v923_v16 = vmul.f32 %v776_v10, %v335_v13  ;;  %1439 = verf.f32 %v492_v61  ;;  %v339_v15 = vmul.f32 0.5, %v2124_v58  ;;  %v494_v36 = vmul.f32 0.70710677, %v2175_v20  ;;  %v2229_v13 = vld [vmem:[%s1833_s30 + $0x240] sm:$0xff]  ;;  %v2238_v61 = vld [vmem:[%s1833_s30 + $0x250] sm:$0xff] }
  0x83   : > { %v1426_v32 = vpop.eup %1425  ;;  %1069 = vst [vmem:[%s1903_s16 + $0x190] sm:$0xff] %v922_v11  ;;  %v778_v0 = vadd.f32 1.0, %v1424_v17  ;;  %1441 = verf.f32 %v493_v25  ;;  %v924_v21 = vmul.f32 %v777_v23, %v336_v19  ;;  %v340_v44 = vmul.f32 0.5, %v2133_v46  ;;  %v2243_v25 = vld [vmem:[%s1833_s30 + $0x258] sm:$0xff] }
  0x84   : > { %v1428_v38 = vpop.eup %1427  ;;  %1070 = vst [vmem:[%s1903_s16 + $0x198] sm:$0xff] %v923_v16  ;;  %v779_v24 = vadd.f32 1.0, %v1426_v32  ;;  %v495_v41 = vmul.f32 0.70710677, %v2181_v53  ;;  %1443 = verf.f32 %v494_v36  ;;  %v496_v58 = vmul.f32 0.70710677, %v2185_v33 }
  0x85   : > { %v925_v47 = vmul.f32 %v778_v0, %v337_v22  ;;  %v780_v29 = vadd.f32 1.0, %v1428_v38  ;;  %1071 = vst [vmem:[%s1903_s16 + $0x1a0] sm:$0xff] %v924_v21  ;;  %v341_v51 = vmul.f32 0.5, %v2139_v48  ;;  %v497_v46 = vmul.f32 0.70710677, %v2191_v26  ;;  %v2252_v38 = vld [vmem:[%s1833_s30 + $0x260] sm:$0xff] }
  0x86   : > { %v1430_v27 = vpop.eup %1429  ;;  %v926_v30 = vmul.f32 %v779_v24, %v338_v28  ;;  %1445 = verf.f32 %v495_v41  ;;  %v342_v50 = vmul.f32 0.5, %v2145_v57  ;;  %v343_v48 = vmul.f32 0.5, %v2151_v63 }
  0x87   : > { %v1432_v55 = vpop.eup %1431  ;;  %1072 = vst [vmem:[%s1903_s16 + $0x1a8] sm:$0xff] %v925_v47  ;;  %v927_v42 = vmul.f32 %v780_v29, %v339_v15  ;;  %v781_v34 = vadd.f32 1.0, %v1430_v27  ;;  %1447 = verf.f32 %v496_v58  ;;  %v498_v62 = vmul.f32 0.70710677, %v2198_v37  ;;  %v2263_v27 = vld [vmem:[%s1833_s30 + $0x270] sm:$0xff] }
  0x88   : > { %1073 = vst [vmem:[%s1903_s16 + $0x1b0] sm:$0xff] %v926_v30  ;;  %v782_v60 = vadd.f32 1.0, %v1432_v55  ;;  %1449 = verf.f32 %v497_v46  ;;  %v1434_v35 = vpop.eup %1433  ;;  %v344_v2 = vmul.f32 0.5, %v2156_v7  ;;  %v499_v39 = vmul.f32 0.70710677, %v2204_v54  ;;  %v2267_v46 = vld [vmem:[%s1833_s30 + $0x278] sm:$0xff] }
  0x89   : > { %1074 = vst [vmem:[%s1903_s16 + $0x1b8] sm:$0xff] %v927_v42  ;;  %v928_v56 = vmul.f32 %v781_v34, %v340_v44  ;;  %v500_v57 = vmul.f32 0.70710677, %v2207_v31  ;;  %v783_v40 = vadd.f32 1.0, %v1434_v35  ;;  %v345_v8 = vmul.f32 0.5, %v2161_v9  ;;  %v2258_v44 = vld [vmem:[%s1833_s30 + $0x268] sm:$0xff] }
  0x8a   : > { %v1436_v63 = vpop.eup %1435  ;;  %v929_v5 = vmul.f32 %v782_v60, %v341_v51  ;;  %1451 = verf.f32 %v498_v62  ;;  %v346_v43 = vmul.f32 0.5, %v2167_v3  ;;  %v501_v7 = vmul.f32 0.70710677, %v2215_v52 }
  0x8b   : > { %v1438_v59 = vpop.eup %1437  ;;  %1075 = vst [vmem:[%s1903_s16 + $0x1c0] sm:$0xff] %v928_v56  ;;  %v784_v12 = vadd.f32 1.0, %v1436_v63  ;;  %1453 = verf.f32 %v499_v39  ;;  %v930_v6 = vmul.f32 %v783_v40, %v342_v50  ;;  %v502_v9 = vmul.f32 0.70710677, %v2222_v1  ;;  %v2276_v56 = vld [vmem:[%s1833_s30 + $0x280] sm:$0xff] }
  0x8c   : > { %v1440_v4 = vpop.eup %1439  ;;  %1076 = vst [vmem:[%s1903_s16 + $0x1c8] sm:$0xff] %v929_v5  ;;  %v785_v14 = vadd.f32 1.0, %v1438_v59  ;;  %1455 = verf.f32 %v500_v57  ;;  %v347_v19 = vmul.f32 0.5, %v2175_v20  ;;  %v503_v22 = vmul.f32 0.70710677, %v2229_v13  ;;  %v2282_v57 = vld [vmem:[%s1833_s30 + $0x288] sm:$0xff] }
  0x8d   : > { %v1442_v18 = vpop.eup %1441  ;;  %v931_v3 = vmul.f32 %v784_v12, %v343_v48  ;;  %v786_v10 = vadd.f32 1.0, %v1440_v4  ;;  %1457 = verf.f32 %v501_v7  ;;  %1077 = vst [vmem:[%s1903_s16 + $0x1d0] sm:$0xff] %v930_v6  ;;  %v348_v23 = vmul.f32 0.5, %v2181_v53  ;;  %v2287_v59 = vld [vmem:[%s1833_s30 + $0x290] sm:$0xff] }
  0x8e   : > { %v932_v49 = vmul.f32 %v785_v14, %v344_v2  ;;  %v787_v11 = vadd.f32 1.0, %v1442_v18  ;;  %1459 = verf.f32 %v502_v9  ;;  %v1444_v17 = vpop.eup %1443  ;;  %v349_v20 = vmul.f32 0.5, %v2185_v33 }
  0x8f   : > { %1078 = vst [vmem:[%s1903_s16 + $0x1d8] sm:$0xff] %v931_v3  ;;  %v933_v16 = vmul.f32 %v786_v10, %v345_v8  ;;  %v504_v28 = vmul.f32 0.70710677, %v2234_v45  ;;  %v788_v15 = vadd.f32 1.0, %v1444_v17  ;;  %1461 = verf.f32 %v503_v22 }
  0x90   : > { %v1446_v32 = vpop.eup %1445  ;;  %1079 = vst [vmem:[%s1903_s16 + $0x1e0] sm:$0xff] %v932_v49  ;;  %v934_v0 = vmul.f32 %v787_v11, %v346_v43  ;;  %v505_v36 = vmul.f32 0.70710677, %v2238_v61  ;;  %v350_v53 = vmul.f32 0.5, %v2191_v26  ;;  %v506_v33 = vmul.f32 0.70710677, %v2243_v25 }
  0x91   : > { %v1448_v21 = vpop.eup %1447  ;;  %1080 = vst [vmem:[%s1903_s16 + $0x1e8] sm:$0xff] %v933_v16  ;;  %v789_v24 = vadd.f32 1.0, %v1446_v32  ;;  %1463 = verf.f32 %v504_v28  ;;  %v935_v47 = vmul.f32 %v788_v15, %v347_v19  ;;  %v351_v58 = vmul.f32 0.5, %v2198_v37  ;;  %v2300_v49 = vld [vmem:[%s1833_s30 + $0x2a0] sm:$0xff]  ;;  %v2305_v16 = vld [vmem:[%s1833_s30 + $0x2a8] sm:$0xff]  ;;  %v2311_v32 = vld [vmem:[%s1833_s30 + $0x2b0] sm:$0xff] }
  0x92   : > { %v1450_v41 = vpop.eup %1449  ;;  %1081 = vst [vmem:[%s1903_s16 + $0x1f0] sm:$0xff] %v934_v0  ;;  %v790_v29 = vadd.f32 1.0, %v1448_v21  ;;  %1465 = verf.f32 %v505_v36  ;;  %v507_v26 = vmul.f32 0.70710677, %v2252_v38  ;;  %v352_v34 = vmul.f32 0.5, %v2204_v54 }
  0x93   : > { %v936_v30 = vmul.f32 %v789_v24, %v348_v23  ;;  %v791_v51 = vadd.f32 1.0, %v1450_v41  ;;  %1467 = verf.f32 %v506_v33  ;;  %1082 = vst [vmem:[%s1903_s16 + $0x1f8] sm:$0xff] %v935_v47  ;;  %v353_v37 = vmul.f32 0.5, %v2207_v31  ;;  %v2318_v33 = vld [vmem:[%s1833_s30 + $0x2b8] sm:$0xff] }
  0x94   : > { %v1452_v55 = vpop.eup %1451  ;;  %v937_v42 = vmul.f32 %v790_v29, %v349_v20  ;;  %v508_v50 = vmul.f32 0.70710677, %v2258_v44  ;;  %1469 = verf.f32 %v507_v26  ;;  %v509_v35 = vmul.f32 0.70710677, %v2263_v27 }
  0x95   : > { %v1454_v60 = vpop.eup %1453  ;;  %1083 = vst [vmem:[%s1903_s16 + $0x200] sm:$0xff] %v936_v30  ;;  %v938_v48 = vmul.f32 %v791_v51, %v350_v53  ;;  %v792_v62 = vadd.f32 1.0, %v1452_v55  ;;  %v354_v54 = vmul.f32 0.5, %v2215_v52  ;;  %v510_v31 = vmul.f32 0.70710677, %v2267_v46 }
  0x96   : > { %v1456_v2 = vpop.eup %1455  ;;  %1084 = vst [vmem:[%s1903_s16 + $0x208] sm:$0xff] %v937_v42  ;;  %v793_v39 = vadd.f32 1.0, %v1454_v60  ;;  %1471 = verf.f32 %v508_v50  ;;  %v355_v8 = vmul.f32 0.5, %v2222_v1  ;;  %v511_v7 = vmul.f32 0.70710677, %v2276_v56  ;;  %v2294_v1 = vld [vmem:[%s1833_s30 + $0x298] sm:$0xff] }
  0x97   : > { %v1458_v63 = vpop.eup %1457  ;;  %1085 = vst [vmem:[%s1903_s16 + $0x210] sm:$0xff] %v938_v48  ;;  %v939_v5 = vmul.f32 %v792_v62, %v351_v58  ;;  %v794_v40 = vadd.f32 1.0, %v1456_v2  ;;  %1473 = verf.f32 %v509_v35  ;;  %v356_v14 = vmul.f32 0.5, %v2229_v13  ;;  %v2324_v58 = vld [vmem:[%s1833_s30 + $0x2c0] sm:$0xff]  ;;  %v2329_v42 = vld [vmem:[%s1833_s30 + $0x2c8] sm:$0xff]  ;;  %v2335_v60 = vld [vmem:[%s1833_s30 + $0x2d0] sm:$0xff] }
  0x98   : > { %v1460_v12 = vpop.eup %1459  ;;  %v940_v43 = vmul.f32 %v793_v39, %v352_v34  ;;  %v795_v52 = vadd.f32 1.0, %v1458_v63  ;;  %1475 = verf.f32 %v510_v31  ;;  %v512_v9 = vmul.f32 0.70710677, %v2282_v57  ;;  %v2342_v31 = vld [vmem:[%s1833_s30 + $0x2d8] sm:$0xff] }
  0x99   : > { %1086 = vst [vmem:[%s1903_s16 + $0x218] sm:$0xff] %v939_v5  ;;  %v941_v4 = vmul.f32 %v794_v40, %v353_v37  ;;  %v796_v6 = vadd.f32 1.0, %v1460_v12  ;;  %v1462_v18 = vpop.eup %1461  ;;  %v357_v10 = vmul.f32 0.5, %v2234_v45  ;;  %1477 = verf.f32 %v511_v7 }
  0x9a   : > { %1087 = vst [vmem:[%s1903_s16 + $0x220] sm:$0xff] %v940_v43  ;;  %v942_v3 = vmul.f32 %v795_v52, %v354_v54  ;;  %v513_v19 = vmul.f32 0.70710677, %v2287_v59  ;;  %v797_v22 = vadd.f32 1.0, %v1462_v18  ;;  %v358_v17 = vmul.f32 0.5, %v2238_v61  ;;  %v2359_v18 = vld [vmem:[%s1833_s30 + $0x2f0] sm:$0xff] }
  0x9b   : > { %v1464_v11 = vpop.eup %1463  ;;  %1088 = vst [vmem:[%s1903_s16 + $0x228] sm:$0xff] %v941_v4  ;;  %v943_v13 = vmul.f32 %v796_v6, %v355_v8  ;;  %1479 = verf.f32 %v512_v9  ;;  %v359_v20 = vmul.f32 0.5, %v2243_v25  ;;  %v514_v28 = vmul.f32 0.70710677, %v2294_v1  ;;  %v2348_v8 = vld [vmem:[%s1833_s30 + $0x2e0] sm:$0xff]  ;;  %v2353_v4 = vld [vmem:[%s1833_s30 + $0x2e8] sm:$0xff] }
  0x9c   : > { %v1466_v23 = vpop.eup %1465  ;;  %1089 = vst [vmem:[%s1903_s16 + $0x230] sm:$0xff] %v942_v3  ;;  %v798_v45 = vadd.f32 1.0, %v1464_v11  ;;  %1481 = verf.f32 %v513_v19  ;;  %v944_v15 = vmul.f32 %v797_v22, %v356_v14  ;;  %v360_v36 = vmul.f32 0.5, %v2252_v38  ;;  %v2365_v11 = vld [vmem:[%s1833_s30 + $0x2f8] sm:$0xff] }
  0x9d   : > { %v1468_v0 = vpop.eup %1467  ;;  %1090 = vst [vmem:[%s1903_s16 + $0x238] sm:$0xff] %v943_v13  ;;  %v799_v61 = vadd.f32 1.0, %v1466_v23  ;;  %v515_v21 = vmul.f32 0.70710677, %v2300_v49  ;;  %1483 = verf.f32 %v514_v28  ;;  %v516_v25 = vmul.f32 0.70710677, %v2305_v16 }
  0x9e   : > { %v945_v24 = vmul.f32 %v798_v45, %v357_v10  ;;  %v800_v53 = vadd.f32 1.0, %v1468_v0  ;;  %v1470_v41 = vpop.eup %1469  ;;  %1091 = vst [vmem:[%s1903_s16 + $0x240] sm:$0xff] %v944_v15  ;;  %v361_v29 = vmul.f32 0.5, %v2258_v44  ;;  %v517_v38 = vmul.f32 0.70710677, %v2311_v32  ;;  %v2372_v28 = vld [vmem:[%s1833_s30 + $0x300] sm:$0xff] }
  0x9f   : > { %v946_v47 = vmul.f32 %v799_v61, %v358_v17  ;;  %1485 = verf.f32 %v515_v21  ;;  %v801_v26 = vadd.f32 1.0, %v1470_v41  ;;  %v362_v55 = vmul.f32 0.5, %v2263_v27  ;;  %v2383_v41 = vld [vmem:[%s1833_s30 + $0x310] sm:$0xff] }
  0xa0   : > { %v1472_v30 = vpop.eup %1471  ;;  %1092 = vst [vmem:[%s1903_s16 + $0x248] sm:$0xff] %v945_v24  ;;  %v947_v51 = vmul.f32 %v800_v53, %v359_v20  ;;  %1487 = verf.f32 %v516_v25  ;;  %v363_v37 = vmul.f32 0.5, %v2267_v46  ;;  %v518_v50 = vmul.f32 0.70710677, %v2318_v33 }
  0xa1   : > { %v1474_v34 = vpop.eup %1473  ;;  %1093 = vst [vmem:[%s1903_s16 + $0x250] sm:$0xff] %v946_v47  ;;  %v802_v44 = vadd.f32 1.0, %v1472_v30  ;;  %1489 = verf.f32 %v517_v38  ;;  %v948_v62 = vmul.f32 %v801_v26, %v360_v36  ;;  %v364_v35 = vmul.f32 0.5, %v2276_v56  ;;  %v2378_v36 = vld [vmem:[%s1833_s30 + $0x308] sm:$0xff]  ;;  %v2387_v38 = vld [vmem:[%s1833_s30 + $0x318] sm:$0xff] }
  0xa2   : > { %v1476_v48 = vpop.eup %1475  ;;  %1094 = vst [vmem:[%s1903_s16 + $0x258] sm:$0xff] %v947_v51  ;;  %v803_v27 = vadd.f32 1.0, %v1474_v34  ;;  %v519_v2 = vmul.f32 0.70710677, %v2324_v58  ;;  %1491 = verf.f32 %v518_v50  ;;  %v520_v46 = vmul.f32 0.70710677, %v2329_v42 }
  0xa3   : > { %v949_v39 = vmul.f32 %v802_v44, %v361_v29  ;;  %v804_v54 = vadd.f32 1.0, %v1476_v48  ;;  %v1478_v63 = vpop.eup %1477  ;;  %1095 = vst [vmem:[%s1903_s16 + $0x260] sm:$0xff] %v948_v62  ;;  %v365_v40 = vmul.f32 0.5, %v2282_v57  ;;  %v521_v56 = vmul.f32 0.70710677, %v2335_v60  ;;  %v2396_v48 = vld [vmem:[%s1833_s30 + $0x320] sm:$0xff] }
  0xa4   : > { %v950_v5 = vmul.f32 %v803_v27, %v362_v55  ;;  %1493 = verf.f32 %v519_v2  ;;  %v805_v52 = vadd.f32 1.0, %v1478_v63  ;;  %v366_v7 = vmul.f32 0.5, %v2287_v59  ;;  %v2407_v63 = vld [vmem:[%s1833_s30 + $0x330] sm:$0xff] }
  0xa5   : > { %v1480_v12 = vpop.eup %1479  ;;  %1096 = vst [vmem:[%s1903_s16 + $0x268] sm:$0xff] %v949_v39  ;;  %v951_v43 = vmul.f32 %v804_v54, %v363_v37  ;;  %1495 = verf.f32 %v520_v46  ;;  %v367_v14 = vmul.f32 0.5, %v2294_v1  ;;  %v522_v9 = vmul.f32 0.70710677, %v2342_v31 }
  0xa6   : > { %v1482_v6 = vpop.eup %1481  ;;  %1097 = vst [vmem:[%s1903_s16 + $0x270] sm:$0xff] %v950_v5  ;;  %v806_v57 = vadd.f32 1.0, %v1480_v12  ;;  %1497 = verf.f32 %v521_v56  ;;  %v952_v3 = vmul.f32 %v805_v52, %v364_v35  ;;  %v368_v59 = vmul.f32 0.5, %v2300_v49  ;;  %v2402_v35 = vld [vmem:[%s1833_s30 + $0x328] sm:$0xff]  ;;  %v2411_v56 = vld [vmem:[%s1833_s30 + $0x338] sm:$0xff] }
  0xa7   : > { %1098 = vst [vmem:[%s1903_s16 + $0x278] sm:$0xff] %v951_v43  ;;  %v807_v10 = vadd.f32 1.0, %v1482_v6  ;;  %v523_v19 = vmul.f32 0.70710677, %v2348_v8  ;;  %v1484_v13 = vpop.eup %1483  ;;  %v369_v1 = vmul.f32 0.5, %v2305_v16  ;;  %1499 = verf.f32 %v522_v9 }
  0xa8   : > { %v953_v22 = vmul.f32 %v806_v57, %v365_v40  ;;  %v524_v17 = vmul.f32 0.70710677, %v2353_v4  ;;  %1099 = vst [vmem:[%s1903_s16 + $0x280] sm:$0xff] %v952_v3  ;;  %v808_v20 = vadd.f32 1.0, %v1484_v13  ;;  %v525_v49 = vmul.f32 0.70710677, %v2359_v18 }
  0xa9   : > { %v1486_v23 = vpop.eup %1485  ;;  %v954_v45 = vmul.f32 %v807_v10, %v366_v7  ;;  %1501 = verf.f32 %v523_v19  ;;  %v370_v16 = vmul.f32 0.5, %v2311_v32  ;;  %v526_v61 = vmul.f32 0.70710677, %v2365_v11  ;;  %v2420_v3 = vld [vmem:[%s1833_s30 + $0x340] sm:$0xff]  ;;  %v2426_v19 = vld [vmem:[%s1833_s30 + $0x348] sm:$0xff] }
  0xaa   : > { %v1488_v0 = vpop.eup %1487  ;;  %1100 = vst [vmem:[%s1903_s16 + $0x288] sm:$0xff] %v953_v22  ;;  %v809_v15 = vadd.f32 1.0, %v1486_v23  ;;  %1503 = verf.f32 %v524_v17  ;;  %v955_v24 = vmul.f32 %v808_v20, %v367_v14  ;;  %v371_v25 = vmul.f32 0.5, %v2318_v33  ;;  %v2431_v23 = vld [vmem:[%s1833_s30 + $0x350] sm:$0xff] }
  0xab   : > { %v1490_v21 = vpop.eup %1489  ;;  %1101 = vst [vmem:[%s1903_s16 + $0x290] sm:$0xff] %v954_v45  ;;  %v810_v53 = vadd.f32 1.0, %v1488_v0  ;;  %1505 = verf.f32 %v525_v49  ;;  %v527_v32 = vmul.f32 0.70710677, %v2372_v28  ;;  %v372_v26 = vmul.f32 0.5, %v2324_v58 }
  0xac   : > { %v956_v47 = vmul.f32 %v809_v15, %v368_v59  ;;  %v811_v29 = vadd.f32 1.0, %v1490_v21  ;;  %1507 = verf.f32 %v526_v61  ;;  %v1492_v30 = vpop.eup %1491  ;;  %1102 = vst [vmem:[%s1903_s16 + $0x298] sm:$0xff] %v955_v24  ;;  %v373_v33 = vmul.f32 0.5, %v2329_v42 }
  0xad   : > { %v957_v51 = vmul.f32 %v810_v53, %v369_v1  ;;  %v528_v55 = vmul.f32 0.70710677, %v2378_v36  ;;  %v812_v37 = vadd.f32 1.0, %v1492_v30  ;;  %1509 = verf.f32 %v527_v32 }
  0xae   : > { %v1494_v34 = vpop.eup %1493  ;;  %1103 = vst [vmem:[%s1903_s16 + $0x2a0] sm:$0xff] %v956_v47  ;;  %v958_v44 = vmul.f32 %v811_v29, %v370_v16  ;;  %v529_v50 = vmul.f32 0.70710677, %v2383_v41  ;;  %v374_v58 = vmul.f32 0.5, %v2335_v60  ;;  %v530_v42 = vmul.f32 0.70710677, %v2387_v38 }
  0xaf   : > { %v1496_v62 = vpop.eup %1495  ;;  %1104 = vst [vmem:[%s1903_s16 + $0x2a8] sm:$0xff] %v957_v51  ;;  %v813_v27 = vadd.f32 1.0, %v1494_v34  ;;  %1511 = verf.f32 %v528_v55  ;;  %v959_v39 = vmul.f32 %v812_v37, %v371_v25  ;;  %v375_v46 = vmul.f32 0.5, %v2342_v31  ;;  %v2444_v47 = vld [vmem:[%s1833_s30 + $0x360] sm:$0xff]  ;;  %v2449_v51 = vld [vmem:[%s1833_s30 + $0x368] sm:$0xff]  ;;  %v2455_v34 = vld [vmem:[%s1833_s30 + $0x370] sm:$0xff] }
  0xb0   : > { %v1498_v2 = vpop.eup %1497  ;;  %1105 = vst [vmem:[%s1903_s16 + $0x2b0] sm:$0xff] %v958_v44  ;;  %v814_v54 = vadd.f32 1.0, %v1496_v62  ;;  %1513 = verf.f32 %v529_v50  ;;  %v531_v60 = vmul.f32 0.70710677, %v2396_v48  ;;  %v376_v52 = vmul.f32 0.5, %v2348_v8 }
  0xb1   : > { %v960_v5 = vmul.f32 %v813_v27, %v372_v26  ;;  %v815_v40 = vadd.f32 1.0, %v1498_v2  ;;  %1515 = verf.f32 %v530_v42  ;;  %v1500_v12 = vpop.eup %1499  ;;  %1106 = vst [vmem:[%s1903_s16 + $0x2b8] sm:$0xff] %v959_v39  ;;  %v377_v31 = vmul.f32 0.5, %v2353_v4  ;;  %v2462_v42 = vld [vmem:[%s1833_s30 + $0x378] sm:$0xff] }
  0xb2   : > { %v961_v43 = vmul.f32 %v814_v54, %v373_v33  ;;  %v532_v7 = vmul.f32 0.70710677, %v2402_v35  ;;  %v816_v14 = vadd.f32 1.0, %v1500_v12  ;;  %1517 = verf.f32 %v531_v60 }
  0xb3   : > { %v1502_v6 = vpop.eup %1501  ;;  %1107 = vst [vmem:[%s1903_s16 + $0x2c0] sm:$0xff] %v960_v5  ;;  %v962_v57 = vmul.f32 %v815_v40, %v374_v58  ;;  %v533_v9 = vmul.f32 0.70710677, %v2407_v63  ;;  %v378_v8 = vmul.f32 0.5, %v2359_v18  ;;  %v534_v4 = vmul.f32 0.70710677, %v2411_v56 }
  0xb4   : > { %v1504_v10 = vpop.eup %1503  ;;  %1108 = vst [vmem:[%s1903_s16 + $0x2c8] sm:$0xff] %v961_v43  ;;  %v817_v59 = vadd.f32 1.0, %v1502_v6  ;;  %1519 = verf.f32 %v532_v7  ;;  %v963_v22 = vmul.f32 %v816_v14, %v375_v46  ;;  %v379_v17 = vmul.f32 0.5, %v2365_v11  ;;  %v2438_v11 = vld [vmem:[%s1833_s30 + $0x358] sm:$0xff]  ;;  %v2468_v46 = vld [vmem:[%s1833_s30 + $0x380] sm:$0xff]  ;;  %v2473_v43 = vld [vmem:[%s1833_s30 + $0x388] sm:$0xff] }
  0xb5   : > { %v1506_v13 = vpop.eup %1505  ;;  %1109 = vst [vmem:[%s1903_s16 + $0x2d0] sm:$0xff] %v962_v57  ;;  %v818_v1 = vadd.f32 1.0, %v1504_v10  ;;  %1521 = verf.f32 %v533_v9  ;;  %v535_v49 = vmul.f32 0.70710677, %v2420_v3  ;;  %v380_v16 = vmul.f32 0.5, %v2372_v28  ;;  %v2479_v6 = vld [vmem:[%s1833_s30 + $0x390] sm:$0xff] }
  0xb6   : > { %v1508_v45 = vpop.eup %1507  ;;  %v964_v20 = vmul.f32 %v817_v59, %v376_v52  ;;  %v819_v18 = vadd.f32 1.0, %v1506_v13  ;;  %1523 = verf.f32 %v534_v4  ;;  %1110 = vst [vmem:[%s1903_s16 + $0x2d8] sm:$0xff] %v963_v22  ;;  %v536_v61 = vmul.f32 0.70710677, %v2426_v19  ;;  %v2486_v4 = vld [vmem:[%s1833_s30 + $0x398] sm:$0xff] }
  0xb7   : > { %v965_v0 = vmul.f32 %v818_v1, %v377_v31  ;;  %v820_v15 = vadd.f32 1.0, %v1508_v45  ;;  %v1510_v21 = vpop.eup %1509  ;;  %v381_v53 = vmul.f32 0.5, %v2378_v36  ;;  %1525 = verf.f32 %v535_v49 }
  0xb8   : > { %1111 = vst [vmem:[%s1903_s16 + $0x2e0] sm:$0xff] %v964_v20  ;;  %v966_v24 = vmul.f32 %v819_v18, %v378_v8  ;;  %v537_v25 = vmul.f32 0.70710677, %v2431_v23  ;;  %v821_v32 = vadd.f32 1.0, %v1510_v21  ;;  %v382_v30 = vmul.f32 0.5, %v2383_v41  ;;  %v2503_v21 = vld [vmem:[%s1833_s30 + $0x3b0] sm:$0xff] }
  0xb9   : > { %v1512_v29 = vpop.eup %1511  ;;  %1112 = vst [vmem:[%s1903_s16 + $0x2e8] sm:$0xff] %v965_v0  ;;  %v967_v28 = vmul.f32 %v820_v15, %v379_v17  ;;  %1527 = verf.f32 %v536_v61  ;;  %v383_v33 = vmul.f32 0.5, %v2387_v38  ;;  %v538_v55 = vmul.f32 0.70710677, %v2438_v11  ;;  %v2492_v17 = vld [vmem:[%s1833_s30 + $0x3a0] sm:$0xff]  ;;  %v2497_v0 = vld [vmem:[%s1833_s30 + $0x3a8] sm:$0xff] }
  0xba   : > { %v1514_v26 = vpop.eup %1513  ;;  %1113 = vst [vmem:[%s1903_s16 + $0x2f0] sm:$0xff] %v966_v24  ;;  %v822_v36 = vadd.f32 1.0, %v1512_v29  ;;  %1529 = verf.f32 %v537_v25  ;;  %v968_v37 = vmul.f32 %v821_v32, %v380_v16  ;;  %v384_v50 = vmul.f32 0.5, %v2396_v48  ;;  %v2509_v29 = vld [vmem:[%s1833_s30 + $0x3b8] sm:$0xff] }
  0xbb   : > { %v1516_v44 = vpop.eup %1515  ;;  %1114 = vst [vmem:[%s1903_s16 + $0x2f8] sm:$0xff] %v967_v28  ;;  %v823_v41 = vadd.f32 1.0, %v1514_v26  ;;  %v539_v62 = vmul.f32 0.70710677, %v2444_v47  ;;  %1531 = verf.f32 %v538_v55  ;;  %v540_v38 = vmul.f32 0.70710677, %v2449_v51 }
  0xbc   : > { %v969_v27 = vmul.f32 %v822_v36, %v381_v53  ;;  %v824_v58 = vadd.f32 1.0, %v1516_v44  ;;  %v1518_v2 = vpop.eup %1517  ;;  %1115 = vst [vmem:[%s1903_s16 + $0x300] sm:$0xff] %v968_v37  ;;  %v385_v54 = vmul.f32 0.5, %v2402_v35  ;;  %v541_v48 = vmul.f32 0.70710677, %v2455_v34  ;;  %v2516_v55 = vld [vmem:[%s1833_s30 + $0x3c0] sm:$0xff] }
  0xbd   : > { %v970_v39 = vmul.f32 %v823_v41, %v382_v30  ;;  %1533 = verf.f32 %v539_v62  ;;  %v825_v60 = vadd.f32 1.0, %v1518_v2  ;;  %v386_v12 = vmul.f32 0.5, %v2407_v63  ;;  %v2527_v2 = vld [vmem:[%s1833_s30 + $0x3d0] sm:$0xff] }
  0xbe   : > { %v1520_v5 = vpop.eup %1519  ;;  %1116 = vst [vmem:[%s1903_s16 + $0x308] sm:$0xff] %v969_v27  ;;  %v971_v40 = vmul.f32 %v824_v58, %v383_v33  ;;  %1535 = verf.f32 %v540_v38  ;;  %v387_v31 = vmul.f32 0.5, %v2411_v56  ;;  %v542_v7 = vmul.f32 0.70710677, %v2462_v42 }
  0xbf   : > { %v1522_v52 = vpop.eup %1521  ;;  %1117 = vst [vmem:[%s1903_s16 + $0x310] sm:$0xff] %v970_v39  ;;  %v826_v35 = vadd.f32 1.0, %v1520_v5  ;;  %1537 = verf.f32 %v541_v48  ;;  %v972_v14 = vmul.f32 %v825_v60, %v384_v50  ;;  %v388_v9 = vmul.f32 0.5, %v2420_v3  ;;  %v2522_v50 = vld [vmem:[%s1833_s30 + $0x3c8] sm:$0xff]  ;;  %v2531_v48 = vld [vmem:[%s1833_s30 + $0x3d8] sm:$0xff] }
  0xc0   : > { %v1524_v57 = vpop.eup %1523  ;;  %1118 = vst [vmem:[%s1903_s16 + $0x318] sm:$0xff] %v971_v40  ;;  %v827_v63 = vadd.f32 1.0, %v1522_v52  ;;  %v543_v10 = vmul.f32 0.70710677, %v2468_v46  ;;  %1539 = verf.f32 %v542_v7  ;;  %v544_v56 = vmul.f32 0.70710677, %v2473_v43 }
  0xc1   : > { %v973_v59 = vmul.f32 %v826_v35, %v385_v54  ;;  %v828_v8 = vadd.f32 1.0, %v1524_v57  ;;  %v1526_v13 = vpop.eup %1525  ;;  %1119 = vst [vmem:[%s1903_s16 + $0x320] sm:$0xff] %v972_v14  ;;  %v389_v1 = vmul.f32 0.5, %v2426_v19  ;;  %v545_v3 = vmul.f32 0.70710677, %v2479_v6  ;;  %v2540_v57 = vld [vmem:[%s1833_s30 + $0x3e0] sm:$0xff] }
  0xc2   : > { %v974_v22 = vmul.f32 %v827_v63, %v386_v12  ;;  %1541 = verf.f32 %v543_v10  ;;  %v829_v18 = vadd.f32 1.0, %v1526_v13  ;;  %v390_v49 = vmul.f32 0.5, %v2431_v23  ;;  %v2551_v13 = vld [vmem:[%s1833_s30 + $0x3f0] sm:$0xff] }
  0xc3   : > { %v1528_v45 = vpop.eup %1527  ;;  %1120 = vst [vmem:[%s1903_s16 + $0x328] sm:$0xff] %v973_v59  ;;  %v975_v20 = vmul.f32 %v828_v8, %v387_v31  ;;  %1543 = verf.f32 %v544_v56  ;;  %v391_v16 = vmul.f32 0.5, %v2438_v11  ;;  %v546_v61 = vmul.f32 0.70710677, %v2486_v4 }
  0xc4   : > { %v1530_v15 = vpop.eup %1529  ;;  %1121 = vst [vmem:[%s1903_s16 + $0x330] sm:$0xff] %v974_v22  ;;  %v830_v19 = vadd.f32 1.0, %v1528_v45  ;;  %1545 = verf.f32 %v545_v3  ;;  %v976_v24 = vmul.f32 %v829_v18, %v388_v9  ;;  %v392_v23 = vmul.f32 0.5, %v2444_v47  ;;  %v2546_v9 = vld [vmem:[%s1833_s30 + $0x3e8] sm:$0xff]  ;;  %v2555_v3 = vld [vmem:[%s1833_s30 + $0x3f8] sm:$0xff] }
  0xc5   : > { %1122 = vst [vmem:[%s1903_s16 + $0x338] sm:$0xff] %v975_v20  ;;  %v831_v53 = vadd.f32 1.0, %v1530_v15  ;;  %v547_v25 = vmul.f32 0.70710677, %v2492_v17  ;;  %v1532_v28 = vpop.eup %1531  ;;  %v393_v11 = vmul.f32 0.5, %v2449_v51  ;;  %1547 = verf.f32 %v546_v61 }
  0xc6   : > { %v977_v32 = vmul.f32 %v830_v19, %v389_v1  ;;  %v548_v30 = vmul.f32 0.70710677, %v2497_v0  ;;  %1123 = vst [vmem:[%s1903_s16 + $0x340] sm:$0xff] %v976_v24  ;;  %v832_v33 = vadd.f32 1.0, %v1532_v28  ;;  %v549_v47 = vmul.f32 0.70710677, %v2503_v21 }
  0xc7   : > { %v1534_v26 = vpop.eup %1533  ;;  %v978_v36 = vmul.f32 %v831_v53, %v390_v49  ;;  %1549 = verf.f32 %v547_v25  ;;  %v394_v51 = vmul.f32 0.5, %v2455_v34  ;;  %v550_v41 = vmul.f32 0.70710677, %v2509_v29  ;;  %v2564_v24 = vld [vmem:[%s1833_s30 + $0x400] sm:$0xff]  ;;  %v2570_v25 = vld [vmem:[%s1833_s30 + $0x408] sm:$0xff] }
  0xc8   : > { %v1536_v44 = vpop.eup %1535  ;;  %1124 = vst [vmem:[%s1903_s16 + $0x348] sm:$0xff] %v977_v32  ;;  %v833_v37 = vadd.f32 1.0, %v1534_v26  ;;  %1551 = verf.f32 %v548_v30  ;;  %v979_v27 = vmul.f32 %v832_v33, %v391_v16  ;;  %v395_v38 = vmul.f32 0.5, %v2462_v42  ;;  %v2575_v26 = vld [vmem:[%s1833_s30 + $0x410] sm:$0xff] }
  0xc9   : > { %v1538_v62 = vpop.eup %1537  ;;  %1125 = vst [vmem:[%s1903_s16 + $0x350] sm:$0xff] %v978_v36  ;;  %v834_v58 = vadd.f32 1.0, %v1536_v44  ;;  %1553 = verf.f32 %v549_v47  ;;  %v551_v34 = vmul.f32 0.70710677, %v2516_v55  ;;  %v396_v60 = vmul.f32 0.5, %v2468_v46 }
  0xca   : > { %v980_v39 = vmul.f32 %v833_v37, %v392_v23  ;;  %v835_v54 = vadd.f32 1.0, %v1538_v62  ;;  %1555 = verf.f32 %v550_v41  ;;  %v1540_v5 = vpop.eup %1539  ;;  %1126 = vst [vmem:[%s1903_s16 + $0x358] sm:$0xff] %v979_v27  ;;  %v397_v42 = vmul.f32 0.5, %v2473_v43 }
  0xcb   : > { %v981_v40 = vmul.f32 %v834_v58, %v393_v11  ;;  %v552_v12 = vmul.f32 0.70710677, %v2522_v50  ;;  %v836_v31 = vadd.f32 1.0, %v1540_v5  ;;  %1557 = verf.f32 %v551_v34 }
  0xcc   : > { %v1542_v52 = vpop.eup %1541  ;;  %1127 = vst [vmem:[%s1903_s16 + $0x360] sm:$0xff] %v980_v39  ;;  %v982_v35 = vmul.f32 %v835_v54, %v394_v51  ;;  %v553_v7 = vmul.f32 0.70710677, %v2527_v2  ;;  %v398_v46 = vmul.f32 0.5, %v2479_v6  ;;  %v554_v43 = vmul.f32 0.70710677, %v2531_v48 }
  0xcd   : > { %v1544_v14 = vpop.eup %1543  ;;  %1128 = vst [vmem:[%s1903_s16 + $0x368] sm:$0xff] %v981_v40  ;;  %v837_v63 = vadd.f32 1.0, %v1542_v52  ;;  %1559 = verf.f32 %v552_v12  ;;  %v983_v59 = vmul.f32 %v836_v31, %v395_v38  ;;  %v399_v56 = vmul.f32 0.5, %v2486_v4  ;;  %v2588_v39 = vld [vmem:[%s1833_s30 + $0x420] sm:$0xff]  ;;  %v2593_v40 = vld [vmem:[%s1833_s30 + $0x428] sm:$0xff]  ;;  %v2599_v52 = vld [vmem:[%s1833_s30 + $0x430] sm:$0xff] }
  0xce   : > { %v1546_v10 = vpop.eup %1545  ;;  %1129 = vst [vmem:[%s1903_s16 + $0x370] sm:$0xff] %v982_v35  ;;  %v838_v8 = vadd.f32 1.0, %v1544_v14  ;;  %1561 = verf.f32 %v553_v7  ;;  %v555_v6 = vmul.f32 0.70710677, %v2540_v57  ;;  %v400_v18 = vmul.f32 0.5, %v2492_v17 }
  0xcf   : > { %v984_v22 = vmul.f32 %v837_v63, %v396_v60  ;;  %v839_v1 = vadd.f32 1.0, %v1546_v10  ;;  %1563 = verf.f32 %v554_v43  ;;  %v1548_v45 = vpop.eup %1547  ;;  %1130 = vst [vmem:[%s1903_s16 + $0x378] sm:$0xff] %v983_v59  ;;  %v401_v4 = vmul.f32 0.5, %v2497_v0  ;;  %v2606_v43 = vld [vmem:[%s1833_s30 + $0x438] sm:$0xff] }
  0xd0   : > { %v985_v20 = vmul.f32 %v838_v8, %v397_v42  ;;  %v556_v49 = vmul.f32 0.70710677, %v2546_v9  ;;  %v840_v16 = vadd.f32 1.0, %v1548_v45  ;;  %1565 = verf.f32 %v555_v6 }
  0xd1   : > { %v1550_v15 = vpop.eup %1549  ;;  %1131 = vst [vmem:[%s1903_s16 + $0x380] sm:$0xff] %v984_v22  ;;  %v986_v19 = vmul.f32 %v839_v1, %v398_v46  ;;  %v557_v61 = vmul.f32 0.70710677, %v2551_v13  ;;  %v402_v17 = vmul.f32 0.5, %v2503_v21  ;;  %v558_v0 = vmul.f32 0.70710677, %v2555_v3 }
  0xd2   : > { %v1552_v53 = vpop.eup %1551  ;;  %1132 = vst [vmem:[%s1903_s16 + $0x388] sm:$0xff] %v985_v20  ;;  %v841_v23 = vadd.f32 1.0, %v1550_v15  ;;  %1567 = verf.f32 %v556_v49  ;;  %v987_v32 = vmul.f32 %v840_v16, %v399_v56  ;;  %v403_v30 = vmul.f32 0.5, %v2509_v29  ;;  %v2582_v29 = vld [vmem:[%s1833_s30 + $0x418] sm:$0xff]  ;;  %v2612_v56 = vld [vmem:[%s1833_s30 + $0x440] sm:$0xff]  ;;  %v2617_v20 = vld [vmem:[%s1833_s30 + $0x448] sm:$0xff] }
  0xd3   : > { %v1554_v28 = vpop.eup %1553  ;;  %1133 = vst [vmem:[%s1903_s16 + $0x390] sm:$0xff] %v986_v19  ;;  %v842_v11 = vadd.f32 1.0, %v1552_v53  ;;  %1569 = verf.f32 %v557_v61  ;;  %v559_v47 = vmul.f32 0.70710677, %v2564_v24  ;;  %v404_v51 = vmul.f32 0.5, %v2516_v55  ;;  %v2623_v15 = vld [vmem:[%s1833_s30 + $0x450] sm:$0xff] }
  0xd4   : > { %v1556_v36 = vpop.eup %1555  ;;  %v988_v33 = vmul.f32 %v841_v23, %v400_v18  ;;  %v843_v21 = vadd.f32 1.0, %v1554_v28  ;;  %1571 = verf.f32 %v558_v0  ;;  %1134 = vst [vmem:[%s1903_s16 + $0x398] sm:$0xff] %v987_v32  ;;  %v560_v41 = vmul.f32 0.70710677, %v2570_v25  ;;  %v2630_v0 = vld [vmem:[%s1833_s30 + $0x458] sm:$0xff] }
  0xd5   : > { %v989_v44 = vmul.f32 %v842_v11, %v401_v4  ;;  %v844_v37 = vadd.f32 1.0, %v1556_v36  ;;  %v1558_v62 = vpop.eup %1557  ;;  %v405_v58 = vmul.f32 0.5, %v2522_v50  ;;  %1573 = verf.f32 %v559_v47 }
  0xd6   : > { %1135 = vst [vmem:[%s1903_s16 + $0x3a0] sm:$0xff] %v988_v33  ;;  %v990_v27 = vmul.f32 %v843_v21, %v402_v17  ;;  %v561_v38 = vmul.f32 0.70710677, %v2575_v26  ;;  %v845_v34 = vadd.f32 1.0, %v1558_v62  ;;  %v406_v5 = vmul.f32 0.5, %v2527_v2  ;;  %v2647_v62 = vld [vmem:[%s1833_s30 + $0x470] sm:$0xff] }
  0xd7   : > { %v1560_v54 = vpop.eup %1559  ;;  %1136 = vst [vmem:[%s1903_s16 + $0x3a8] sm:$0xff] %v989_v44  ;;  %v991_v55 = vmul.f32 %v844_v37, %v403_v30  ;;  %1575 = verf.f32 %v560_v41  ;;  %v407_v42 = vmul.f32 0.5, %v2531_v48  ;;  %v562_v12 = vmul.f32 0.70710677, %v2582_v29  ;;  %v2636_v30 = vld [vmem:[%s1833_s30 + $0x460] sm:$0xff]  ;;  %v2641_v44 = vld [vmem:[%s1833_s30 + $0x468] sm:$0xff] }
  0xd8   : > { %v1562_v60 = vpop.eup %1561  ;;  %1137 = vst [vmem:[%s1903_s16 + $0x3b0] sm:$0xff] %v990_v27  ;;  %v846_v50 = vadd.f32 1.0, %v1560_v54  ;;  %1577 = verf.f32 %v561_v38  ;;  %v992_v31 = vmul.f32 %v845_v34, %v404_v51  ;;  %v408_v7 = vmul.f32 0.5, %v2540_v57  ;;  %v2653_v54 = vld [vmem:[%s1833_s30 + $0x478] sm:$0xff] }
  0xd9   : > { %v1564_v35 = vpop.eup %1563  ;;  %1138 = vst [vmem:[%s1903_s16 + $0x3b8] sm:$0xff] %v991_v55  ;;  %v847_v2 = vadd.f32 1.0, %v1562_v60  ;;  %v563_v14 = vmul.f32 0.70710677, %v2588_v39  ;;  %1579 = verf.f32 %v562_v12  ;;  %v564_v48 = vmul.f32 0.70710677, %v2593_v40 }
  0xda   : > { %v993_v63 = vmul.f32 %v846_v50, %v405_v58  ;;  %v848_v46 = vadd.f32 1.0, %v1564_v35  ;;  %v1566_v10 = vpop.eup %1565  ;;  %1139 = vst [vmem:[%s1903_s16 + $0x3c0] sm:$0xff] %v992_v31  ;;  %v409_v8 = vmul.f32 0.5, %v2546_v9  ;;  %v565_v57 = vmul.f32 0.70710677, %v2599_v52  ;;  %v2660_v12 = vld [vmem:[%s1833_s30 + $0x480] sm:$0xff] }
  0xdb   : > { %v994_v59 = vmul.f32 %v847_v2, %v406_v5  ;;  %1581 = verf.f32 %v563_v14  ;;  %v849_v6 = vadd.f32 1.0, %v1566_v10  ;;  %v410_v45 = vmul.f32 0.5, %v2551_v13  ;;  %v2671_v10 = vld [vmem:[%s1833_s30 + $0x490] sm:$0xff] }
  0xdc   : > { %v1568_v22 = vpop.eup %1567  ;;  %1140 = vst [vmem:[%s1903_s16 + $0x3c8] sm:$0xff] %v993_v63  ;;  %v995_v1 = vmul.f32 %v848_v46, %v407_v42  ;;  %1583 = verf.f32 %v564_v48  ;;  %v411_v4 = vmul.f32 0.5, %v2555_v3  ;;  %v566_v49 = vmul.f32 0.70710677, %v2606_v43 }
  0xdd   : > { %v1570_v18 = vpop.eup %1569  ;;  %1141 = vst [vmem:[%s1903_s16 + $0x3d0] sm:$0xff] %v994_v59  ;;  %v850_v9 = vadd.f32 1.0, %v1568_v22  ;;  %1585 = verf.f32 %v565_v57  ;;  %v996_v16 = vmul.f32 %v849_v6, %v408_v7  ;;  %v412_v61 = vmul.f32 0.5, %v2564_v24  ;;  %v2666_v7 = vld [vmem:[%s1833_s30 + $0x488] sm:$0xff] }
  0xde   : > { %v1572_v19 = vpop.eup %1571  ;;  %1142 = vst [vmem:[%s1903_s16 + $0x3d8] sm:$0xff] %v995_v1  ;;  %v851_v13 = vadd.f32 1.0, %v1570_v18  ;;  %v567_v53 = vmul.f32 0.70710677, %v2612_v56  ;;  %1587 = verf.f32 %v566_v49  ;;  %v568_v3 = vmul.f32 0.70710677, %v2617_v20 }
  0xdf   : > { %v997_v23 = vmul.f32 %v850_v9, %v409_v8  ;;  %v852_v17 = vadd.f32 1.0, %v1572_v19  ;;  %v1574_v28 = vpop.eup %1573  ;;  %1143 = vst [vmem:[%s1903_s16 + $0x3e0] sm:$0xff] %v996_v16  ;;  %v413_v11 = vmul.f32 0.5, %v2570_v25  ;;  %v569_v24 = vmul.f32 0.70710677, %v2623_v15 }
  0xe0   : > { %v998_v32 = vmul.f32 %v851_v13, %v410_v45  ;;  %1589 = verf.f32 %v567_v53  ;;  %v853_v21 = vadd.f32 1.0, %v1574_v28  ;;  %v414_v47 = vmul.f32 0.5, %v2575_v26 }
  0xe1   : > { %v1576_v36 = vpop.eup %1575  ;;  %1144 = vst [vmem:[%s1903_s16 + $0x3e8] sm:$0xff] %v997_v23  ;;  %v999_v33 = vmul.f32 %v852_v17, %v411_v4  ;;  %1591 = verf.f32 %v568_v3  ;;  %v415_v51 = vmul.f32 0.5, %v2582_v29  ;;  %v570_v41 = vmul.f32 0.70710677, %v2630_v0 }
  0xe2   : > { %v1578_v37 = vpop.eup %1577  ;;  %1145 = vst [vmem:[%s1903_s16 + $0x3f0] sm:$0xff] %v998_v32  ;;  %v854_v25 = vadd.f32 1.0, %v1576_v36  ;;  %1593 = verf.f32 %v569_v24  ;;  %v1000_v27 = vmul.f32 %v853_v21, %v412_v61  ;;  %v416_v26 = vmul.f32 0.5, %v2588_v39 }
  0xe3   : > { %1146 = vst [vmem:[%s1903_s16 + $0x3f8] sm:$0xff] %v999_v33  ;;  %v855_v58 = vadd.f32 1.0, %v1578_v37  ;;  %v571_v38 = vmul.f32 0.70710677, %v2636_v30  ;;  %v1580_v55 = vpop.eup %1579  ;;  %v417_v29 = vmul.f32 0.5, %v2593_v40  ;;  %1595 = verf.f32 %v570_v41 }
  0xe4   : > { %v1001_v34 = vmul.f32 %v854_v25, %v413_v11  ;;  %v572_v5 = vmul.f32 0.70710677, %v2641_v44  ;;  %1147 = vst [vmem:[%s1903_s16 + $0x400] sm:$0xff] %v1000_v27  ;;  %v856_v42 = vadd.f32 1.0, %v1580_v55  ;;  %v573_v39 = vmul.f32 0.70710677, %v2647_v62 }
  0xe5   : > { %v1582_v60 = vpop.eup %1581  ;;  %v1002_v50 = vmul.f32 %v855_v58, %v414_v47  ;;  %1597 = verf.f32 %v571_v38  ;;  %v418_v40 = vmul.f32 0.5, %v2599_v52  ;;  %v574_v2 = vmul.f32 0.70710677, %v2653_v54 }
  0xe6   : > { %v1584_v35 = vpop.eup %1583  ;;  %1148 = vst [vmem:[%s1903_s16 + $0x408] sm:$0xff] %v1001_v34  ;;  %v857_v31 = vadd.f32 1.0, %v1582_v60  ;;  %1599 = verf.f32 %v572_v5  ;;  %v1003_v63 = vmul.f32 %v856_v42, %v415_v51  ;;  %v419_v48 = vmul.f32 0.5, %v2606_v43 }
  0xe7   : > { %v1586_v14 = vpop.eup %1585  ;;  %1149 = vst [vmem:[%s1903_s16 + $0x410] sm:$0xff] %v1002_v50  ;;  %v858_v46 = vadd.f32 1.0, %v1584_v35  ;;  %1601 = verf.f32 %v573_v39  ;;  %v575_v52 = vmul.f32 0.70710677, %v2660_v12  ;;  %v420_v1 = vmul.f32 0.5, %v2612_v56 }
  0xe8   : > { %v1004_v59 = vmul.f32 %v857_v31, %v416_v26  ;;  %v859_v8 = vadd.f32 1.0, %v1586_v14  ;;  %1603 = verf.f32 %v574_v2  ;;  %v1588_v57 = vpop.eup %1587  ;;  %1150 = vst [vmem:[%s1903_s16 + $0x418] sm:$0xff] %v1003_v63  ;;  %v421_v6 = vmul.f32 0.5, %v2617_v20 }
  0xe9   : > { %v1005_v22 = vmul.f32 %v858_v46, %v417_v29  ;;  %v576_v45 = vmul.f32 0.70710677, %v2666_v7  ;;  %v860_v9 = vadd.f32 1.0, %v1588_v57  ;;  %1605 = verf.f32 %v575_v52 }
  0xea   : > { %v1590_v43 = vpop.eup %1589  ;;  %1151 = vst [vmem:[%s1903_s16 + $0x420] sm:$0xff] %v1004_v59  ;;  %v1006_v18 = vmul.f32 %v859_v8, %v418_v40  ;;  %v577_v4 = vmul.f32 0.70710677, %v2671_v10  ;;  %v422_v16 = vmul.f32 0.5, %v2623_v15  ;;  %v423_v23 = vmul.f32 0.5, %v2630_v0 }
  0xeb   : > { %v1592_v49 = vpop.eup %1591  ;;  %1152 = vst [vmem:[%s1903_s16 + $0x428] sm:$0xff] %v1005_v22  ;;  %v861_v19 = vadd.f32 1.0, %v1590_v43  ;;  %1607 = verf.f32 %v576_v45  ;;  %v1007_v20 = vmul.f32 %v860_v9, %v419_v48  ;;  %v424_v28 = vmul.f32 0.5, %v2636_v30 }
  0xec   : > { %v1594_v56 = vpop.eup %1593  ;;  %1153 = vst [vmem:[%s1903_s16 + $0x430] sm:$0xff] %v1006_v18  ;;  %v862_v13 = vadd.f32 1.0, %v1592_v49  ;;  %1609 = verf.f32 %v577_v4  ;;  %v425_v24 = vmul.f32 0.5, %v2641_v44  ;;  %v426_v21 = vmul.f32 0.5, %v2647_v62 }
  0xed   : > { %v1008_v61 = vmul.f32 %v861_v19, %v420_v1  ;;  %v863_v53 = vadd.f32 1.0, %v1594_v56  ;;  %v1596_v17 = vpop.eup %1595  ;;  %1154 = vst [vmem:[%s1903_s16 + $0x438] sm:$0xff] %v1007_v20  ;;  %v427_v30 = vmul.f32 0.5, %v2653_v54  ;;  %v428_v58 = vmul.f32 0.5, %v2660_v12 }
  0xee   : > { %v1009_v3 = vmul.f32 %v862_v13, %v421_v6  ;;  %v864_v11 = vadd.f32 1.0, %v1596_v17  ;;  %v429_v38 = vmul.f32 0.5, %v2666_v7  ;;  %v430_v29 = vmul.f32 0.5, %v2671_v10 }
  0xef   : > { %v1598_v32 = vpop.eup %1597  ;;  %1155 = vst [vmem:[%s1903_s16 + $0x440] sm:$0xff] %v1008_v61  ;;  %v1010_v15 = vmul.f32 %v863_v53, %v422_v16 }
  0xf0   : > { %v1600_v36 = vpop.eup %1599  ;;  %1156 = vst [vmem:[%s1903_s16 + $0x448] sm:$0xff] %v1009_v3  ;;  %v865_v33 = vadd.f32 1.0, %v1598_v32  ;;  %v1011_v47 = vmul.f32 %v864_v11, %v423_v23 }
  0xf1   : > { %v1602_v0 = vpop.eup %1601  ;;  %1157 = vst [vmem:[%s1903_s16 + $0x450] sm:$0xff] %v1010_v15  ;;  %v866_v37 = vadd.f32 1.0, %v1600_v36 }
  0xf2   : > { %v1604_v25 = vpop.eup %1603  ;;  %v1012_v51 = vmul.f32 %v865_v33, %v424_v28  ;;  %v867_v41 = vadd.f32 1.0, %v1602_v0  ;;  %1158 = vst [vmem:[%s1903_s16 + $0x458] sm:$0xff] %v1011_v47 }
  0xf3   : > { %v1013_v44 = vmul.f32 %v866_v37, %v425_v24  ;;  %v868_v27 = vadd.f32 1.0, %v1604_v25  ;;  %v1606_v62 = vpop.eup %1605 }
  0xf4   : > { %1159 = vst [vmem:[%s1903_s16 + $0x460] sm:$0xff] %v1012_v51  ;;  %v1014_v26 = vmul.f32 %v867_v41, %v426_v21  ;;  %v869_v34 = vadd.f32 1.0, %v1606_v62 }
  0xf5   : > { %v1608_v55 = vpop.eup %1607  ;;  %1160 = vst [vmem:[%s1903_s16 + $0x468] sm:$0xff] %v1013_v44  ;;  %v1015_v54 = vmul.f32 %v868_v27, %v427_v30 }
  0xf6   : > { %v1610_v5 = vpop.eup %1609  ;;  %1161 = vst [vmem:[%s1903_s16 + $0x470] sm:$0xff] %v1014_v26  ;;  %v870_v60 = vadd.f32 1.0, %v1608_v55  ;;  %v1016_v50 = vmul.f32 %v869_v34, %v428_v58 }
  0xf7   : > { %1162 = vst [vmem:[%s1903_s16 + $0x478] sm:$0xff] %v1015_v54  ;;  %v871_v42 = vadd.f32 1.0, %v1610_v5 }
  0xf8   : > { %v1017_v39 = vmul.f32 %v870_v60, %v429_v38  ;;  %1163 = vst [vmem:[%s1903_s16 + $0x480] sm:$0xff] %v1016_v50 }
  0xf9   : > { %v1018_v12 = vmul.f32 %v871_v42, %v430_v29 }
  0xfa   : > { %1164 = vst [vmem:[%s1903_s16 + $0x488] sm:$0xff] %v1017_v39 }
  0xfb   : > { %1165 = vst [vmem:[%s1903_s16 + $0x490] sm:$0xff] %v1018_v12 }
  0xfc   : > { %1654 = shalt.err (!%p1651_p3)
}
  0xfd   : > { %s1655_s13 = scalar_lea.hbm %s2705_s28, 18816  ;;  %s1659_s20 = scalar_lea.hbm %s2755_s1, 37632 }
  0xfe   : > { %p1656_p5 = scmp.ne.s32.totalorder %s2705_s28, %s1655_s13  ;;  %p1660_p9 = scmp.lt.u32.totalorder %s2705_s28, %s2755_s1 }
  0xff   : > { %p1661_p0 = scmp.lt.u32.totalorder %s1659_s20, %s1655_s13  ;;  %p1663_p6 = scmp.lt.u32.totalorder %s1655_s13, %s2705_s28 }
 0x100   : > { %p1657_p7 = pnand %p1656_p5, %p2762_p11 }
 0x101   : > { %p1662_p2 = por %p1661_p0, %p1660_p9 }
 0x102   : > { %p1658_p8 = pneg %p1657_p7 }
 0x103   : > { %p1664_p12 = por %p1663_p6, %p1662_p2 }
 0x105   : > { %p1665_p13 = pnand %p1664_p12, %p1658_p8 }
 0x107   : > { %1668 = shalt.err (!%p1665_p13)
}
 0x108   : > { %s1714_s26 = smov 2688   ;;  %s1715_s29 = smov 5376  }
 0x109   : > { %s1716_s30 = smov 168  }
 0x10a   : > { %1267 = dma.vmem_to_hbm [thread:$0]  (%p2762_p11), %s2707_s25, 18816, %s2705_s28, %s1167_s2, %s1714_s26, %s1715_s29, %s1716_s30  }
 0x10b PF: > { %s1195_s16 = sand.u32 1, %s1695_s6   ;;  %p2763_p4 = scmp.ne.s32.totalorder %s2759_s18, 0 }
 0x10c   : > { %p2764_p10 = scmp.ge.s32.totalorder %s1707_s9, 2  ;;  %s1196_s24 = scalar_lea.sflag [#allocation4], %s1195_s16 }
 0x10e   : > { %p1274_p1 = pnand %p2764_p10, %p2763_p4 }
 0x110   : > { %1690 = dma.done.wait (!%p1274_p1), %s1196_s24, 18816  }
 0x111   : > { %1692 = vsyncadd (!%p1274_p1), %s1196_s24, 4294948480  ;;  %p14_p3 = scmp.ge.s32.totalorder %s1752_s12, 4   ;;  %s2765_s6 = smov %s1699_s7 }
 0x112   : > { %s2766_s7 = smov %s1703_s8  ;;  %s2767_s8 = smov %s1764_s15 }
 0x113   : > { %s2768_s9 = smov %s1752_s12  ;;  %16 = sbr.rel (!%p14_p3) target bundleno = 5 (0x5), region = 69 }
 0x11a   :  { %1201 = vsyncpa [#allocation3], 1 }
 0x11b   :  { %1203 = vsyncpa [#allocation3 + $0x1], 1 }
 0x11c   :  { %1204 = vsyncpa [#allocation4], 1 }
 0x11d   :  { %1206 = vsyncpa [#allocation4 + $0x1], 1 }

</bundles_post_ra>
